<compile_context>
chip_gen: v7x
topology: tpu7x:2x2x1
jax: 0.10.0
libtpu: 0.0.40
codegen_flags: <defaults>
</compile_context>

<pallas_src>
import jax
import jax.numpy as jnp
from jax import lax
from jax.experimental import pallas as pl
from jax.experimental.pallas import tpu as pltpu

# ---- small, module-consistent sizes ----
B = 2        # batch
C = 16       # n_channels
T = 16       # time steps
S = 32       # n_sources (attention embed dim, conv channels)
NH = 4       # n_heads
DH = S // NH
H = 32       # classifier hidden size
NC = 5       # n_classes
K = 7        # max conv kernel size; smaller kernels zero-padded to 7 (math-equivalent)
PAD = K // 2
BT = B * T                 # 32
NHBT = NH * BT             # 128  (head-stacked row count)
LN_EPS = 1e-5
BN_EPS = 1e-5
QSCALE = 1.0 / (DH ** 0.5)

assert BT == S == 32 and NHBT == 128, "packing layout assumes BT == S == 32, NH*BT == 128"

# ---- row layout of the width-32 weight/constant slab ----
ROW_WPROJ = 0
ROW_WQ = ROW_WPROJ + S            # 32
ROW_WK = ROW_WQ + S               # 64
ROW_WV = ROW_WK + S               # 96
ROW_WOUT = ROW_WV + S             # 128
ROW_W1 = ROW_WOUT + S             # 160
ROW_WTAP = ROW_W1 + H             # 192   (3*K blocks of (S,S) tap weights)
ROW_HMASK = ROW_WTAP + 3 * K * S  # 864   (NH*BT, S) head-lane mask
ROW_SHIFT = ROW_HMASK + NHBT      # 992   (K*BT, BT) per-tap shift matrices
ROW_BIAS = ROW_SHIFT + K * BT     # 1216  (16, S) bias/scale rows
N_BIAS_ROWS = 16
WSLAB_ROWS = ROW_BIAS + N_BIAS_ROWS   # 1232

# ---- row layout of the width-128 slab ----
MROW_MASK = 0                      # (128,128) additive attention mask (head AND batch)
MROW_W2T = NHBT                    # 128: (H,128) w2.T padded to 128 lanes
MROW_B2 = MROW_W2T + H             # 160: (1,128) b2 padded
MSLAB_ROWS = ((MROW_B2 + 1 + 7) // 8) * 8   # 168


def _matT(a, w):
    """a @ w.T via dot_general (contract last dims), f32 accumulation."""
    return lax.dot_general(a, w, (((1,), (1,)), ((), ())),
                           preferred_element_type=jnp.float32)


def attention_cnn_kernel(x_ref, w_ref, m_ref, out_ref):
    x2d = x_ref[...]                                   # (BT, S): channels zero-padded to S lanes

    # --- packed parameter views (sublane slices of the two slabs) ---
    wproj = w_ref[ROW_WPROJ:ROW_WPROJ + S, :]
    wq = w_ref[ROW_WQ:ROW_WQ + S, :]
    wk = w_ref[ROW_WK:ROW_WK + S, :]
    wv = w_ref[ROW_WV:ROW_WV + S, :]
    wout = w_ref[ROW_WOUT:ROW_WOUT + S, :]
    w1 = w_ref[ROW_W1:ROW_W1 + H, :]
    hmask = w_ref[ROW_HMASK:ROW_HMASK + NHBT, :]       # (128, S)  head-lane 0/1 mask
    shift = w_ref[ROW_SHIFT:ROW_SHIFT + K * BT, :]     # (224, BT) per-tap shift matrices
    bias = w_ref[ROW_BIAS:ROW_BIAS + N_BIAS_ROWS, :]   # (16, S)

    bproj = bias[0:1, :]
    bq = bias[1:2, :]
    bk = bias[2:3, :]
    bv = bias[3:4, :]
    bout = bias[4:5, :]
    lng = bias[5:6, :]
    lnb = bias[6:7, :]
    b1 = bias[10:11, :]

    amask = m_ref[MROW_MASK:MROW_MASK + NHBT, :]       # (128, 128) additive mask
    w2t = m_ref[MROW_W2T:MROW_W2T + H, :]              # (H, 128)
    b2r = m_ref[MROW_B2:MROW_B2 + 1, :]                # (1, 128)

    # ---- input projection: Linear(C -> S), whole batch at once ----
    y = _matT(x2d, wproj) + bproj                      # (BT, S)

    # ---- head-stacked multi-head self-attention (SpatialAttention) ----
    q = (_matT(y, wq) + bq) * QSCALE                   # (BT, S)
    k = _matT(y, wk) + bk
    v = _matT(y, wv) + bv

    # replicate K/V along sublanes (one copy per head) and zero out non-head lanes
    k_sel = jnp.concatenate([k, k, k, k], axis=0) * hmask     # (128, S)
    v_sel = jnp.concatenate([v, v, v, v], axis=0) * hmask     # (128, S)

    # score block for head h lives in key columns [h*BT:(h+1)*BT]; query rows are
    # head-independent pre-mask, so tile along sublanes and let the mask pick heads.
    s_small = _matT(q, k_sel)                                  # (BT, 128)
    s_full = jnp.concatenate([s_small, s_small, s_small, s_small], axis=0) + amask  # (128,128)

    # single softmax over the full 128x128 tile (masked entries underflow to exact 0)
    s_full = s_full - jnp.max(s_full, axis=-1, keepdims=True)
    p = jnp.exp(s_full)
    p = p * pl.reciprocal(jnp.sum(p, axis=-1, keepdims=True), approx=False)

    o_stack = jnp.dot(p, v_sel, preferred_element_type=jnp.float32)    # (128, S)
    # head blocks are lane-disjoint -> concat over heads == sum over 32-row sublane blocks
    attn_cat = (o_stack[0:BT] + o_stack[BT:2 * BT]
                + o_stack[2 * BT:3 * BT] + o_stack[3 * BT:4 * BT])     # (BT, S)
    attn = _matT(attn_cat, wout) + bout

    # residual + LayerNorm (inside SpatialAttention), then outer residual
    r = y + attn
    mu = jnp.mean(r, axis=-1, keepdims=True)
    var = jnp.mean((r - mu) * (r - mu), axis=-1, keepdims=True)
    normed = (r - mu) * lax.rsqrt(var + LN_EPS) * lng + lnb
    xc = y + normed                                             # (BT, S)

    # ---- three temporal conv blocks (eval BN folded into weights/bias) ----
    # shift first (tap-shifted copies of the activation rows, zero-padded per batch),
    # then contract channels per tap with full-lane (S,S) weight blocks.
    for c in range(3):
        xs = jnp.dot(shift, xc, preferred_element_type=jnp.float32)    # (K*BT, S)
        acc = None
        for j in range(K):
            row0 = ROW_WTAP + (c * K + j) * S
            wt = w_ref[row0:row0 + S, :]                                # (S, S) tap weight
            contrib = _matT(xs[j * BT:(j + 1) * BT, :], wt)             # (BT, S)
            acc = contrib if acc is None else acc + contrib
        xc = jnp.maximum(acc + bias[7 + c:8 + c, :], 0.0)

    # ---- classifier: time pool (sublane reduction) + 2-layer MLP, lane-dense output ----
    pooled_rows = [jnp.sum(xc[b * T:(b + 1) * T, :], axis=0, keepdims=True) for b in range(B)]
    pooled8 = jnp.concatenate(
        pooled_rows + [jnp.zeros((8 - B, S), jnp.float32)], axis=0) * (1.0 / T)   # (8, S)
    h1 = jnp.maximum(_matT(pooled8, w1) + b1, 0.0)                                # (8, H)
    out_ref[...] = jnp.dot(h1, w2t, preferred_element_type=jnp.float32) + b2r     # (8, 128)


def _pack_params(params):
    """Host-side packing (run once): fold eval BN, build tap weights, masks, two slabs."""
    (wproj, bproj, win, bin_, wout, bout, lng, lnb,
     wconv, bconv, bng, bnb, bnm, bnv, w1, b1, w2, b2) = params

    # fold eval-mode BatchNorm into conv weight / bias
    sbn = bng * lax.rsqrt(bnv + BN_EPS)                        # (3, S)
    wconv_f = wconv * sbn[:, :, None, None]                    # (3, S, S, K)
    bconv_f = (bconv - bnm) * sbn + bnb                        # (3, S)

    # per-tap conv weights: rows [(c*K + j)*S + o], lanes i
    wtap = jnp.transpose(wconv_f, (0, 3, 1, 2)).reshape(3 * K * S, S)

    # head-lane mask: row block h keeps lanes of head h
    rows = jnp.arange(NHBT)
    hmask = (jnp.arange(S)[None, :] // DH == (rows // BT)[:, None]).astype(jnp.float32)

    # per-tap shift matrices stacked on sublanes: shift[j*BT + r, r'] selects xc[r + j - PAD]
    rr = jnp.arange(BT)[:, None]
    rc = jnp.arange(BT)[None, :]
    same_batch = (rr // T) == (rc // T)
    shift = jnp.concatenate(
        [((rc == rr + (j - PAD)) & same_batch).astype(jnp.float32) for j in range(K)],
        axis=0)                                                # (K*BT, BT)

    # packed bias / scale rows (16, S)
    zero_row = jnp.zeros((1, S), jnp.float32)
    bias_rows = jnp.concatenate(
        [bproj[None], bin_[0:S][None], bin_[S:2 * S][None], bin_[2 * S:3 * S][None],
         bout[None], lng[None], lnb[None], bconv_f, b1[None]]
        + [zero_row] * (N_BIAS_ROWS - 11), axis=0)

    wproj_p = jnp.pad(wproj, ((0, 0), (0, S - C)))             # pad channels 16 -> 32 lanes

    wslab = jnp.concatenate(
        [wproj_p, win[0:S], win[S:2 * S], win[2 * S:3 * S], wout, w1,
         wtap, hmask, shift, bias_rows], axis=0).astype(jnp.float32)   # (1232, 32)
    assert wslab.shape == (WSLAB_ROWS, S)

    # block-diagonal additive mask: 0 iff same head AND same batch, else -1e9
    heads = rows // BT
    rbatch = (rows % BT) // T
    ok = (heads[:, None] == heads[None, :]) & (rbatch[:, None] == rbatch[None, :])
    amask = jnp.where(ok, 0.0, -1e9).astype(jnp.float32)       # (128, 128)

    w2t = jnp.zeros((H, 128), jnp.float32).at[:, :NC].set(w2.T)
    b2row = jnp.zeros((1, 128), jnp.float32).at[0, :NC].set(b2)
    mslab = jnp.concatenate(
        [amask, w2t, b2row,
         jnp.zeros((MSLAB_ROWS - (NHBT + H + 1), 128), jnp.float32)], axis=0)    # (168, 128)
    assert mslab.shape == (MSLAB_ROWS, 128)

    return wslab, mslab


def build_forward(params):
    """Pack constants once (hoisted out of the per-call path) and return a jitted forward."""
    wslab, mslab = _pack_params(params)

    def fwd(x):
        # NCW -> (B*T, C) rows, channel lanes zero-padded to S
        x2d = jnp.transpose(x, (0, 2, 1)).reshape(BT, C)
        x2d = jnp.pad(x2d, ((0, 0), (0, S - C)))

        out = pl.pallas_call(
            attention_cnn_kernel,
            out_shape=jax.ShapeDtypeStruct((8, 128), jnp.float32),   # lane-dense output tile
            grid=(1,),
            in_specs=[
                pl.BlockSpec((BT, S), lambda i: (0, 0)),              # x
                pl.BlockSpec((WSLAB_ROWS, S), lambda i: (0, 0)),      # width-32 slab
                pl.BlockSpec((MSLAB_ROWS, 128), lambda i: (0, 0)),    # width-128 slab
            ],
            out_specs=pl.BlockSpec((8, 128), lambda i: (0, 0)),
            compiler_params=pltpu.CompilerParams(
                dimension_semantics=("arbitrary",)),
        )(x2d, wslab, mslab)
        return out[:B, :NC]

    return jax.jit(fwd)


def reference_forward(x, params):
    """Pure-JAX reference mirroring the PyTorch eval-mode forward."""
    (wproj, bproj, win, bin_, wout, bout, lng, lnb,
     wconv, bconv, bng, bnb, bnm, bnv, w1, b1, w2, b2) = params
    xt = jnp.transpose(x, (0, 2, 1))                           # (B, T, C)
    y = jnp.einsum('btc,sc->bts', xt, wproj) + bproj           # (B, T, S)

    q = jnp.einsum('bts,os->bto', y, win[:S]) + bin_[:S]
    k = jnp.einsum('bts,os->bto', y, win[S:2 * S]) + bin_[S:2 * S]
    v = jnp.einsum('bts,os->bto', y, win[2 * S:]) + bin_[2 * S:]
    qh = q.reshape(B, T, NH, DH)
    kh = k.reshape(B, T, NH, DH)
    vh = v.reshape(B, T, NH, DH)
    s = jnp.einsum('bqhd,bkhd->bhqk', qh, kh) / (DH ** 0.5)
    p = jax.nn.softmax(s, axis=-1)
    o = jnp.einsum('bhqk,bkhd->bqhd', p, vh).reshape(B, T, S)
    attn = jnp.einsum('bto,po->btp', o, wout) + bout
    r = y + attn
    mu = r.mean(-1, keepdims=True)
    var = ((r - mu) ** 2).mean(-1, keepdims=True)
    normed = (r - mu) / jnp.sqrt(var + LN_EPS) * lng + lnb
    z = y + normed                                             # (B, T, S)

    xc = jnp.transpose(z, (0, 2, 1))                           # (B, S, T)
    for c in range(3):
        xp = jnp.pad(xc, ((0, 0), (0, 0), (PAD, PAD)))
        acc = jnp.zeros((B, S, T), jnp.float32) + bconv[c][None, :, None]
        for j in range(K):
            acc = acc + jnp.einsum('oi,bit->bot', wconv[c, :, :, j], xp[:, :, j:j + T])
        sbn = bng[c] / jnp.sqrt(bnv[c] + BN_EPS)
        acc = (acc - bnm[c][None, :, None]) * sbn[None, :, None] + bnb[c][None, :, None]
        xc = jnp.maximum(acc, 0.0)
    pooled = xc.mean(-1)                                       # (B, S)
    h1 = jnp.maximum(pooled @ w1.T + b1, 0.0)
    return h1 @ w2.T + b2


def make_params(key):
    ks = jax.random.split(key, 20)

    def nrm(k, shape, scale=0.1):
        return (jax.random.normal(k, shape) * scale).astype(jnp.float32)

    wproj = nrm(ks[0], (S, C))
    bproj = nrm(ks[1], (S,))
    win = nrm(ks[2], (3 * S, S))
    bin_ = nrm(ks[3], (3 * S,))
    wout = nrm(ks[4], (S, S))
    bout = nrm(ks[5], (S,))
    lng = (1.0 + nrm(ks[6], (S,), 0.05)).astype(jnp.float32)
    lnb = nrm(ks[7], (S,), 0.05)

    # Conv1d weights for k = 7, 5, 3, zero-padded symmetrically to K=7 (math-equivalent).
    wconv_list = []
    for i, kk in enumerate([7, 5, 3]):
        w = nrm(ks[8 + i], (S, S, kk), 0.1)
        p = (K - kk) // 2
        wconv_list.append(jnp.pad(w, ((0, 0), (0, 0), (p, p))))
    wconv = jnp.stack(wconv_list).astype(jnp.float32)          # (3, S, S, K)

    bconv = nrm(ks[11], (3, S))
    bng = (1.0 + nrm(ks[12], (3, S), 0.05)).astype(jnp.float32)
    bnb = nrm(ks[13], (3, S), 0.05)
    bnm = nrm(ks[14], (3, S), 0.05)
    bnv = (1.0 + 0.5 * jax.random.uniform(ks[15], (3, S))).astype(jnp.float32)

    w1 = nrm(ks[16], (H, S))
    b1 = nrm(ks[17], (H,))
    w2 = nrm(ks[18], (NC, H))
    b2 = nrm(ks[19], (NC,))
    return (wproj, bproj, win, bin_, wout, bout, lng, lnb,
            wconv, bconv, bng, bnb, bnm, bnv, w1, b1, w2, b2)


if __name__ == "__main__":
    root = jax.random.PRNGKey(0)
    kx, kp = jax.random.split(root)
    x = jax.random.normal(kx, (B, C, T), dtype=jnp.float32)
    params = make_params(kp)

    fwd = build_forward(params)            # packing + jit happen once, outside the call path
    out = jax.block_until_ready(fwd(x))

    ref = reference_forward(x, params)
    if not jnp.allclose(out, ref, atol=1e-3, rtol=1e-3):
        raise AssertionError(
            f"Pallas output mismatch vs reference; max abs diff = "
            f"{float(jnp.max(jnp.abs(out - ref)))}")
    print("KERNEL_OK")
</pallas_src>

<mosaic_0001>
module attributes {stable_mosaic.version = 11 : i64} {
  func.func @attention_cnn_kernel(%arg0: i32, %arg1: memref<32x32xf32, #tpu.memory_space<vmem>>, %arg2: memref<1232x32xf32, #tpu.memory_space<vmem>>, %arg3: memref<168x128xf32, #tpu.memory_space<vmem>>, %arg4: memref<8x128xf32, #tpu.memory_space<vmem>>) attributes {dimension_semantics = [#tpu.dimension_semantics<arbitrary>], iteration_bounds = array<i64: 1>, scalar_prefetch = 0 : i64, scratch_operands = 0 : i64, tpu.core_type = #tpu.core_type<tc>, window_params = [{pipeline_mode = #tpu.pipeline_mode<synchronous>, transform_indices = @transform_0, window_bounds = array<i64: 32, 32>}, {pipeline_mode = #tpu.pipeline_mode<synchronous>, transform_indices = @transform_1, window_bounds = array<i64: 1232, 32>}, {pipeline_mode = #tpu.pipeline_mode<synchronous>, transform_indices = @transform_2, window_bounds = array<i64: 168, 128>}, {pipeline_mode = #tpu.pipeline_mode<synchronous>, transform_indices = @transform_3, window_bounds = array<i64: 8, 128>}]} {
    %c0 = arith.constant 0 : index
    %c0_0 = arith.constant 0 : index
    %0 = vector.load %arg1[%c0, %c0_0] : memref<32x32xf32, #tpu.memory_space<vmem>>, vector<32x32xf32>
    %c0_1 = arith.constant 0 : index
    %c0_2 = arith.constant 0 : index
    %1 = vector.load %arg2[%c0_1, %c0_2] : memref<1232x32xf32, #tpu.memory_space<vmem>>, vector<32x32xf32>
    %c32 = arith.constant 32 : index
    %c0_3 = arith.constant 0 : index
    %2 = vector.load %arg2[%c32, %c0_3] : memref<1232x32xf32, #tpu.memory_space<vmem>>, vector<32x32xf32>
    %c64 = arith.constant 64 : index
    %c0_4 = arith.constant 0 : index
    %3 = vector.load %arg2[%c64, %c0_4] : memref<1232x32xf32, #tpu.memory_space<vmem>>, vector<32x32xf32>
    %c96 = arith.constant 96 : index
    %c0_5 = arith.constant 0 : index
    %4 = vector.load %arg2[%c96, %c0_5] : memref<1232x32xf32, #tpu.memory_space<vmem>>, vector<32x32xf32>
    %c128 = arith.constant 128 : index
    %c0_6 = arith.constant 0 : index
    %5 = vector.load %arg2[%c128, %c0_6] : memref<1232x32xf32, #tpu.memory_space<vmem>>, vector<32x32xf32>
    %c160 = arith.constant 160 : index
    %c0_7 = arith.constant 0 : index
    %6 = vector.load %arg2[%c160, %c0_7] : memref<1232x32xf32, #tpu.memory_space<vmem>>, vector<32x32xf32>
    %c864 = arith.constant 864 : index
    %c0_8 = arith.constant 0 : index
    %7 = vector.load %arg2[%c864, %c0_8] : memref<1232x32xf32, #tpu.memory_space<vmem>>, vector<128x32xf32>
    %c992 = arith.constant 992 : index
    %c0_9 = arith.constant 0 : index
    %8 = vector.load %arg2[%c992, %c0_9] : memref<1232x32xf32, #tpu.memory_space<vmem>>, vector<224x32xf32>
    %c1216 = arith.constant 1216 : index
    %c0_10 = arith.constant 0 : index
    %9 = vector.load %arg2[%c1216, %c0_10] : memref<1232x32xf32, #tpu.memory_space<vmem>>, vector<16x32xf32>
    %10 = vector.extract_strided_slice %9 {offsets = [0, 0], sizes = [1, 32], strides = [1, 1]} : vector<16x32xf32> to vector<1x32xf32>
    %11 = vector.extract_strided_slice %9 {offsets = [1, 0], sizes = [1, 32], strides = [1, 1]} : vector<16x32xf32> to vector<1x32xf32>
    %12 = vector.extract_strided_slice %9 {offsets = [2, 0], sizes = [1, 32], strides = [1, 1]} : vector<16x32xf32> to vector<1x32xf32>
    %13 = vector.extract_strided_slice %9 {offsets = [3, 0], sizes = [1, 32], strides = [1, 1]} : vector<16x32xf32> to vector<1x32xf32>
    %14 = vector.extract_strided_slice %9 {offsets = [4, 0], sizes = [1, 32], strides = [1, 1]} : vector<16x32xf32> to vector<1x32xf32>
    %15 = vector.extract_strided_slice %9 {offsets = [5, 0], sizes = [1, 32], strides = [1, 1]} : vector<16x32xf32> to vector<1x32xf32>
    %16 = vector.extract_strided_slice %9 {offsets = [6, 0], sizes = [1, 32], strides = [1, 1]} : vector<16x32xf32> to vector<1x32xf32>
    %17 = vector.extract_strided_slice %9 {offsets = [10, 0], sizes = [1, 32], strides = [1, 1]} : vector<16x32xf32> to vector<1x32xf32>
    %c0_11 = arith.constant 0 : index
    %c0_12 = arith.constant 0 : index
    %18 = vector.load %arg3[%c0_11, %c0_12] : memref<168x128xf32, #tpu.memory_space<vmem>>, vector<128x128xf32>
    %c128_13 = arith.constant 128 : index
    %c0_14 = arith.constant 0 : index
    %19 = vector.load %arg3[%c128_13, %c0_14] : memref<168x128xf32, #tpu.memory_space<vmem>>, vector<32x128xf32>
    %c160_15 = arith.constant 160 : index
    %c0_16 = arith.constant 0 : index
    %20 = vector.load %arg3[%c160_15, %c0_16] : memref<168x128xf32, #tpu.memory_space<vmem>>, vector<1x128xf32>
    %cst = arith.constant dense<0.000000e+00> : vector<32x32xf32>
    %21 = tpu.matmul %0, %1, %cst {dimension_numbers = #tpu.dot_dimension_numbers<[1], [1], [0], [0], [0, 0, 1, 0], [], []>} : vector<32x32xf32>, vector<32x32xf32>, vector<32x32xf32> -> vector<32x32xf32>
    %22 = vector.broadcast %10 : vector<1x32xf32> to vector<32x32xf32>
    %23 = arith.addf %21, %22 : vector<32x32xf32>
    %cst_17 = arith.constant dense<0.000000e+00> : vector<32x32xf32>
    %24 = tpu.matmul %23, %2, %cst_17 {dimension_numbers = #tpu.dot_dimension_numbers<[1], [1], [0], [0], [0, 0, 1, 0], [], []>} : vector<32x32xf32>, vector<32x32xf32>, vector<32x32xf32> -> vector<32x32xf32>
    %25 = vector.broadcast %11 : vector<1x32xf32> to vector<32x32xf32>
    %26 = arith.addf %24, %25 : vector<32x32xf32>
    %cst_18 = arith.constant 0.353553385 : f32
    %27 = vector.broadcast %cst_18 : f32 to vector<32x32xf32>
    %28 = arith.mulf %26, %27 : vector<32x32xf32>
    %cst_19 = arith.constant dense<0.000000e+00> : vector<32x32xf32>
    %29 = tpu.matmul %23, %3, %cst_19 {dimension_numbers = #tpu.dot_dimension_numbers<[1], [1], [0], [0], [0, 0, 1, 0], [], []>} : vector<32x32xf32>, vector<32x32xf32>, vector<32x32xf32> -> vector<32x32xf32>
    %30 = vector.broadcast %12 : vector<1x32xf32> to vector<32x32xf32>
    %31 = arith.addf %29, %30 : vector<32x32xf32>
    %cst_20 = arith.constant dense<0.000000e+00> : vector<32x32xf32>
    %32 = tpu.matmul %23, %4, %cst_20 {dimension_numbers = #tpu.dot_dimension_numbers<[1], [1], [0], [0], [0, 0, 1, 0], [], []>} : vector<32x32xf32>, vector<32x32xf32>, vector<32x32xf32> -> vector<32x32xf32>
    %33 = vector.broadcast %13 : vector<1x32xf32> to vector<32x32xf32>
    %34 = arith.addf %32, %33 : vector<32x32xf32>
    %35 = tpu.concatenate %31, %31, %31, %31 in 0 : vector<32x32xf32>, vector<32x32xf32>, vector<32x32xf32>, vector<32x32xf32> -> vector<128x32xf32>
    %36 = arith.mulf %35, %7 : vector<128x32xf32>
    %37 = tpu.concatenate %34, %34, %34, %34 in 0 : vector<32x32xf32>, vector<32x32xf32>, vector<32x32xf32>, vector<32x32xf32> -> vector<128x32xf32>
    %38 = arith.mulf %37, %7 : vector<128x32xf32>
    %cst_21 = arith.constant dense<0.000000e+00> : vector<32x128xf32>
    %39 = tpu.matmul %28, %36, %cst_21 {dimension_numbers = #tpu.dot_dimension_numbers<[1], [1], [0], [0], [0, 0, 1, 0], [], []>} : vector<32x32xf32>, vector<128x32xf32>, vector<32x128xf32> -> vector<32x128xf32>
    %40 = tpu.concatenate %39, %39, %39, %39 in 0 : vector<32x128xf32>, vector<32x128xf32>, vector<32x128xf32>, vector<32x128xf32> -> vector<128x128xf32>
    %41 = arith.addf %40, %18 : vector<128x128xf32>
    %cst_22 = arith.constant dense<0xFF800000> : vector<128xf32>
    %42 = vector.multi_reduction <maximumf>, %41, %cst_22 [1] : vector<128x128xf32> to vector<128xf32>
    %43 = vector.shape_cast %42 : vector<128xf32> to vector<128x1xf32>
    %44 = vector.broadcast %43 : vector<128x1xf32> to vector<128x128xf32>
    %45 = arith.subf %41, %44 : vector<128x128xf32>
    %46 = math.exp %45 : vector<128x128xf32>
    %cst_23 = arith.constant dense<0.000000e+00> : vector<128xf32>
    %47 = vector.multi_reduction <add>, %46, %cst_23 [1] : vector<128x128xf32> to vector<128xf32>
    %48 = vector.shape_cast %47 : vector<128xf32> to vector<128x1xf32>
    %49 = tpu.reciprocal %48 : vector<128x1xf32> -> vector<128x1xf32>
    %50 = vector.broadcast %49 : vector<128x1xf32> to vector<128x128xf32>
    %51 = arith.mulf %46, %50 : vector<128x128xf32>
    %cst_24 = arith.constant dense<0.000000e+00> : vector<128x32xf32>
    %52 = tpu.matmul %51, %38, %cst_24 {dimension_numbers = #tpu.dot_dimension_numbers<[1], [0], [0], [1], [0, 0, 1, 1], [], []>} : vector<128x128xf32>, vector<128x32xf32>, vector<128x32xf32> -> vector<128x32xf32>
    %53 = vector.extract_strided_slice %52 {offsets = [0, 0], sizes = [32, 32], strides = [1, 1]} : vector<128x32xf32> to vector<32x32xf32>
    %54 = vector.extract_strided_slice %52 {offsets = [32, 0], sizes = [32, 32], strides = [1, 1]} : vector<128x32xf32> to vector<32x32xf32>
    %55 = arith.addf %53, %54 : vector<32x32xf32>
    %56 = vector.extract_strided_slice %52 {offsets = [64, 0], sizes = [32, 32], strides = [1, 1]} : vector<128x32xf32> to vector<32x32xf32>
    %57 = arith.addf %55, %56 : vector<32x32xf32>
    %58 = vector.extract_strided_slice %52 {offsets = [96, 0], sizes = [32, 32], strides = [1, 1]} : vector<128x32xf32> to vector<32x32xf32>
    %59 = arith.addf %57, %58 : vector<32x32xf32>
    %cst_25 = arith.constant dense<0.000000e+00> : vector<32x32xf32>
    %60 = tpu.matmul %59, %5, %cst_25 {dimension_numbers = #tpu.dot_dimension_numbers<[1], [1], [0], [0], [0, 0, 1, 0], [], []>} : vector<32x32xf32>, vector<32x32xf32>, vector<32x32xf32> -> vector<32x32xf32>
    %61 = vector.broadcast %14 : vector<1x32xf32> to vector<32x32xf32>
    %62 = arith.addf %60, %61 : vector<32x32xf32>
    %63 = arith.addf %23, %62 : vector<32x32xf32>
    %cst_26 = arith.constant dense<0.000000e+00> : vector<32xf32>
    %64 = vector.multi_reduction <add>, %63, %cst_26 [1] : vector<32x32xf32> to vector<32xf32>
    %65 = vector.shape_cast %64 : vector<32xf32> to vector<32x1xf32>
    %cst_27 = arith.constant 3.200000e+01 : f32
    %66 = vector.broadcast %cst_27 : f32 to vector<32x1xf32>
    %67 = arith.divf %65, %66 : vector<32x1xf32>
    %68 = vector.broadcast %67 : vector<32x1xf32> to vector<32x32xf32>
    %69 = arith.subf %63, %68 : vector<32x32xf32>
    %70 = vector.broadcast %67 : vector<32x1xf32> to vector<32x32xf32>
    %71 = arith.subf %63, %70 : vector<32x32xf32>
    %72 = arith.mulf %69, %71 : vector<32x32xf32>
    %cst_28 = arith.constant dense<0.000000e+00> : vector<32xf32>
    %73 = vector.multi_reduction <add>, %72, %cst_28 [1] : vector<32x32xf32> to vector<32xf32>
    %74 = vector.shape_cast %73 : vector<32xf32> to vector<32x1xf32>
    %cst_29 = arith.constant 3.200000e+01 : f32
    %75 = vector.broadcast %cst_29 : f32 to vector<32x1xf32>
    %76 = arith.divf %74, %75 : vector<32x1xf32>
    %77 = vector.broadcast %67 : vector<32x1xf32> to vector<32x32xf32>
    %78 = arith.subf %63, %77 : vector<32x32xf32>
    %cst_30 = arith.constant 9.99999974E-6 : f32
    %79 = vector.broadcast %cst_30 : f32 to vector<32x1xf32>
    %80 = arith.addf %76, %79 : vector<32x1xf32>
    %81 = math.rsqrt %80 : vector<32x1xf32>
    %82 = vector.broadcast %81 : vector<32x1xf32> to vector<32x32xf32>
    %83 = arith.mulf %78, %82 : vector<32x32xf32>
    %84 = vector.broadcast %15 : vector<1x32xf32> to vector<32x32xf32>
    %85 = arith.mulf %83, %84 : vector<32x32xf32>
    %86 = vector.broadcast %16 : vector<1x32xf32> to vector<32x32xf32>
    %87 = arith.addf %85, %86 : vector<32x32xf32>
    %88 = arith.addf %23, %87 : vector<32x32xf32>
    %cst_31 = arith.constant dense<0.000000e+00> : vector<224x32xf32>
    %89 = tpu.matmul %8, %88, %cst_31 {dimension_numbers = #tpu.dot_dimension_numbers<[1], [0], [0], [1], [0, 0, 1, 1], [], []>} : vector<224x32xf32>, vector<32x32xf32>, vector<224x32xf32> -> vector<224x32xf32>
    %c192 = arith.constant 192 : index
    %c0_32 = arith.constant 0 : index
    %90 = vector.load %arg2[%c192, %c0_32] : memref<1232x32xf32, #tpu.memory_space<vmem>>, vector<32x32xf32>
    %91 = vector.extract_strided_slice %89 {offsets = [0, 0], sizes = [32, 32], strides = [1, 1]} : vector<224x32xf32> to vector<32x32xf32>
    %cst_33 = arith.constant dense<0.000000e+00> : vector<32x32xf32>
    %92 = tpu.matmul %91, %90, %cst_33 {dimension_numbers = #tpu.dot_dimension_numbers<[1], [1], [0], [0], [0, 0, 1, 0], [], []>} : vector<32x32xf32>, vector<32x32xf32>, vector<32x32xf32> -> vector<32x32xf32>
    %c224 = arith.constant 224 : index
    %c0_34 = arith.constant 0 : index
    %93 = vector.load %arg2[%c224, %c0_34] : memref<1232x32xf32, #tpu.memory_space<vmem>>, vector<32x32xf32>
    %94 = vector.extract_strided_slice %89 {offsets = [32, 0], sizes = [32, 32], strides = [1, 1]} : vector<224x32xf32> to vector<32x32xf32>
    %cst_35 = arith.constant dense<0.000000e+00> : vector<32x32xf32>
    %95 = tpu.matmul %94, %93, %cst_35 {dimension_numbers = #tpu.dot_dimension_numbers<[1], [1], [0], [0], [0, 0, 1, 0], [], []>} : vector<32x32xf32>, vector<32x32xf32>, vector<32x32xf32> -> vector<32x32xf32>
    %96 = arith.addf %92, %95 : vector<32x32xf32>
    %c256 = arith.constant 256 : index
    %c0_36 = arith.constant 0 : index
    %97 = vector.load %arg2[%c256, %c0_36] : memref<1232x32xf32, #tpu.memory_space<vmem>>, vector<32x32xf32>
    %98 = vector.extract_strided_slice %89 {offsets = [64, 0], sizes = [32, 32], strides = [1, 1]} : vector<224x32xf32> to vector<32x32xf32>
    %cst_37 = arith.constant dense<0.000000e+00> : vector<32x32xf32>
    %99 = tpu.matmul %98, %97, %cst_37 {dimension_numbers = #tpu.dot_dimension_numbers<[1], [1], [0], [0], [0, 0, 1, 0], [], []>} : vector<32x32xf32>, vector<32x32xf32>, vector<32x32xf32> -> vector<32x32xf32>
    %100 = arith.addf %96, %99 : vector<32x32xf32>
    %c288 = arith.constant 288 : index
    %c0_38 = arith.constant 0 : index
    %101 = vector.load %arg2[%c288, %c0_38] : memref<1232x32xf32, #tpu.memory_space<vmem>>, vector<32x32xf32>
    %102 = vector.extract_strided_slice %89 {offsets = [96, 0], sizes = [32, 32], strides = [1, 1]} : vector<224x32xf32> to vector<32x32xf32>
    %cst_39 = arith.constant dense<0.000000e+00> : vector<32x32xf32>
    %103 = tpu.matmul %102, %101, %cst_39 {dimension_numbers = #tpu.dot_dimension_numbers<[1], [1], [0], [0], [0, 0, 1, 0], [], []>} : vector<32x32xf32>, vector<32x32xf32>, vector<32x32xf32> -> vector<32x32xf32>
    %104 = arith.addf %100, %103 : vector<32x32xf32>
    %c320 = arith.constant 320 : index
    %c0_40 = arith.constant 0 : index
    %105 = vector.load %arg2[%c320, %c0_40] : memref<1232x32xf32, #tpu.memory_space<vmem>>, vector<32x32xf32>
    %106 = vector.extract_strided_slice %89 {offsets = [128, 0], sizes = [32, 32], strides = [1, 1]} : vector<224x32xf32> to vector<32x32xf32>
    %cst_41 = arith.constant dense<0.000000e+00> : vector<32x32xf32>
    %107 = tpu.matmul %106, %105, %cst_41 {dimension_numbers = #tpu.dot_dimension_numbers<[1], [1], [0], [0], [0, 0, 1, 0], [], []>} : vector<32x32xf32>, vector<32x32xf32>, vector<32x32xf32> -> vector<32x32xf32>
    %108 = arith.addf %104, %107 : vector<32x32xf32>
    %c352 = arith.constant 352 : index
    %c0_42 = arith.constant 0 : index
    %109 = vector.load %arg2[%c352, %c0_42] : memref<1232x32xf32, #tpu.memory_space<vmem>>, vector<32x32xf32>
    %110 = vector.extract_strided_slice %89 {offsets = [160, 0], sizes = [32, 32], strides = [1, 1]} : vector<224x32xf32> to vector<32x32xf32>
    %cst_43 = arith.constant dense<0.000000e+00> : vector<32x32xf32>
    %111 = tpu.matmul %110, %109, %cst_43 {dimension_numbers = #tpu.dot_dimension_numbers<[1], [1], [0], [0], [0, 0, 1, 0], [], []>} : vector<32x32xf32>, vector<32x32xf32>, vector<32x32xf32> -> vector<32x32xf32>
    %112 = arith.addf %108, %111 : vector<32x32xf32>
    %c384 = arith.constant 384 : index
    %c0_44 = arith.constant 0 : index
    %113 = vector.load %arg2[%c384, %c0_44] : memref<1232x32xf32, #tpu.memory_space<vmem>>, vector<32x32xf32>
    %114 = vector.extract_strided_slice %89 {offsets = [192, 0], sizes = [32, 32], strides = [1, 1]} : vector<224x32xf32> to vector<32x32xf32>
    %cst_45 = arith.constant dense<0.000000e+00> : vector<32x32xf32>
    %115 = tpu.matmul %114, %113, %cst_45 {dimension_numbers = #tpu.dot_dimension_numbers<[1], [1], [0], [0], [0, 0, 1, 0], [], []>} : vector<32x32xf32>, vector<32x32xf32>, vector<32x32xf32> -> vector<32x32xf32>
    %116 = arith.addf %112, %115 : vector<32x32xf32>
    %117 = vector.extract_strided_slice %9 {offsets = [7, 0], sizes = [1, 32], strides = [1, 1]} : vector<16x32xf32> to vector<1x32xf32>
    %118 = vector.broadcast %117 : vector<1x32xf32> to vector<32x32xf32>
    %119 = arith.addf %116, %118 : vector<32x32xf32>
    %cst_46 = arith.constant 0.000000e+00 : f32
    %120 = vector.broadcast %cst_46 : f32 to vector<32x32xf32>
    %121 = arith.maximumf %119, %120 : vector<32x32xf32>
    %cst_47 = arith.constant dense<0.000000e+00> : vector<224x32xf32>
    %122 = tpu.matmul %8, %121, %cst_47 {dimension_numbers = #tpu.dot_dimension_numbers<[1], [0], [0], [1], [0, 0, 1, 1], [], []>} : vector<224x32xf32>, vector<32x32xf32>, vector<224x32xf32> -> vector<224x32xf32>
    %c416 = arith.constant 416 : index
    %c0_48 = arith.constant 0 : index
    %123 = vector.load %arg2[%c416, %c0_48] : memref<1232x32xf32, #tpu.memory_space<vmem>>, vector<32x32xf32>
    %124 = vector.extract_strided_slice %122 {offsets = [0, 0], sizes = [32, 32], strides = [1, 1]} : vector<224x32xf32> to vector<32x32xf32>
    %cst_49 = arith.constant dense<0.000000e+00> : vector<32x32xf32>
    %125 = tpu.matmul %124, %123, %cst_49 {dimension_numbers = #tpu.dot_dimension_numbers<[1], [1], [0], [0], [0, 0, 1, 0], [], []>} : vector<32x32xf32>, vector<32x32xf32>, vector<32x32xf32> -> vector<32x32xf32>
    %c448 = arith.constant 448 : index
    %c0_50 = arith.constant 0 : index
    %126 = vector.load %arg2[%c448, %c0_50] : memref<1232x32xf32, #tpu.memory_space<vmem>>, vector<32x32xf32>
    %127 = vector.extract_strided_slice %122 {offsets = [32, 0], sizes = [32, 32], strides = [1, 1]} : vector<224x32xf32> to vector<32x32xf32>
    %cst_51 = arith.constant dense<0.000000e+00> : vector<32x32xf32>
    %128 = tpu.matmul %127, %126, %cst_51 {dimension_numbers = #tpu.dot_dimension_numbers<[1], [1], [0], [0], [0, 0, 1, 0], [], []>} : vector<32x32xf32>, vector<32x32xf32>, vector<32x32xf32> -> vector<32x32xf32>
    %129 = arith.addf %125, %128 : vector<32x32xf32>
    %c480 = arith.constant 480 : index
    %c0_52 = arith.constant 0 : index
    %130 = vector.load %arg2[%c480, %c0_52] : memref<1232x32xf32, #tpu.memory_space<vmem>>, vector<32x32xf32>
    %131 = vector.extract_strided_slice %122 {offsets = [64, 0], sizes = [32, 32], strides = [1, 1]} : vector<224x32xf32> to vector<32x32xf32>
    %cst_53 = arith.constant dense<0.000000e+00> : vector<32x32xf32>
    %132 = tpu.matmul %131, %130, %cst_53 {dimension_numbers = #tpu.dot_dimension_numbers<[1], [1], [0], [0], [0, 0, 1, 0], [], []>} : vector<32x32xf32>, vector<32x32xf32>, vector<32x32xf32> -> vector<32x32xf32>
    %133 = arith.addf %129, %132 : vector<32x32xf32>
    %c512 = arith.constant 512 : index
    %c0_54 = arith.constant 0 : index
    %134 = vector.load %arg2[%c512, %c0_54] : memref<1232x32xf32, #tpu.memory_space<vmem>>, vector<32x32xf32>
    %135 = vector.extract_strided_slice %122 {offsets = [96, 0], sizes = [32, 32], strides = [1, 1]} : vector<224x32xf32> to vector<32x32xf32>
    %cst_55 = arith.constant dense<0.000000e+00> : vector<32x32xf32>
    %136 = tpu.matmul %135, %134, %cst_55 {dimension_numbers = #tpu.dot_dimension_numbers<[1], [1], [0], [0], [0, 0, 1, 0], [], []>} : vector<32x32xf32>, vector<32x32xf32>, vector<32x32xf32> -> vector<32x32xf32>
    %137 = arith.addf %133, %136 : vector<32x32xf32>
    %c544 = arith.constant 544 : index
    %c0_56 = arith.constant 0 : index
    %138 = vector.load %arg2[%c544, %c0_56] : memref<1232x32xf32, #tpu.memory_space<vmem>>, vector<32x32xf32>
    %139 = vector.extract_strided_slice %122 {offsets = [128, 0], sizes = [32, 32], strides = [1, 1]} : vector<224x32xf32> to vector<32x32xf32>
    %cst_57 = arith.constant dense<0.000000e+00> : vector<32x32xf32>
    %140 = tpu.matmul %139, %138, %cst_57 {dimension_numbers = #tpu.dot_dimension_numbers<[1], [1], [0], [0], [0, 0, 1, 0], [], []>} : vector<32x32xf32>, vector<32x32xf32>, vector<32x32xf32> -> vector<32x32xf32>
    %141 = arith.addf %137, %140 : vector<32x32xf32>
    %c576 = arith.constant 576 : index
    %c0_58 = arith.constant 0 : index
    %142 = vector.load %arg2[%c576, %c0_58] : memref<1232x32xf32, #tpu.memory_space<vmem>>, vector<32x32xf32>
    %143 = vector.extract_strided_slice %122 {offsets = [160, 0], sizes = [32, 32], strides = [1, 1]} : vector<224x32xf32> to vector<32x32xf32>
    %cst_59 = arith.constant dense<0.000000e+00> : vector<32x32xf32>
    %144 = tpu.matmul %143, %142, %cst_59 {dimension_numbers = #tpu.dot_dimension_numbers<[1], [1], [0], [0], [0, 0, 1, 0], [], []>} : vector<32x32xf32>, vector<32x32xf32>, vector<32x32xf32> -> vector<32x32xf32>
    %145 = arith.addf %141, %144 : vector<32x32xf32>
    %c608 = arith.constant 608 : index
    %c0_60 = arith.constant 0 : index
    %146 = vector.load %arg2[%c608, %c0_60] : memref<1232x32xf32, #tpu.memory_space<vmem>>, vector<32x32xf32>
    %147 = vector.extract_strided_slice %122 {offsets = [192, 0], sizes = [32, 32], strides = [1, 1]} : vector<224x32xf32> to vector<32x32xf32>
    %cst_61 = arith.constant dense<0.000000e+00> : vector<32x32xf32>
    %148 = tpu.matmul %147, %146, %cst_61 {dimension_numbers = #tpu.dot_dimension_numbers<[1], [1], [0], [0], [0, 0, 1, 0], [], []>} : vector<32x32xf32>, vector<32x32xf32>, vector<32x32xf32> -> vector<32x32xf32>
    %149 = arith.addf %145, %148 : vector<32x32xf32>
    %150 = vector.extract_strided_slice %9 {offsets = [8, 0], sizes = [1, 32], strides = [1, 1]} : vector<16x32xf32> to vector<1x32xf32>
    %151 = vector.broadcast %150 : vector<1x32xf32> to vector<32x32xf32>
    %152 = arith.addf %149, %151 : vector<32x32xf32>
    %cst_62 = arith.constant 0.000000e+00 : f32
    %153 = vector.broadcast %cst_62 : f32 to vector<32x32xf32>
    %154 = arith.maximumf %152, %153 : vector<32x32xf32>
    %cst_63 = arith.constant dense<0.000000e+00> : vector<224x32xf32>
    %155 = tpu.matmul %8, %154, %cst_63 {dimension_numbers = #tpu.dot_dimension_numbers<[1], [0], [0], [1], [0, 0, 1, 1], [], []>} : vector<224x32xf32>, vector<32x32xf32>, vector<224x32xf32> -> vector<224x32xf32>
    %c640 = arith.constant 640 : index
    %c0_64 = arith.constant 0 : index
    %156 = vector.load %arg2[%c640, %c0_64] : memref<1232x32xf32, #tpu.memory_space<vmem>>, vector<32x32xf32>
    %157 = vector.extract_strided_slice %155 {offsets = [0, 0], sizes = [32, 32], strides = [1, 1]} : vector<224x32xf32> to vector<32x32xf32>
    %cst_65 = arith.constant dense<0.000000e+00> : vector<32x32xf32>
    %158 = tpu.matmul %157, %156, %cst_65 {dimension_numbers = #tpu.dot_dimension_numbers<[1], [1], [0], [0], [0, 0, 1, 0], [], []>} : vector<32x32xf32>, vector<32x32xf32>, vector<32x32xf32> -> vector<32x32xf32>
    %c672 = arith.constant 672 : index
    %c0_66 = arith.constant 0 : index
    %159 = vector.load %arg2[%c672, %c0_66] : memref<1232x32xf32, #tpu.memory_space<vmem>>, vector<32x32xf32>
    %160 = vector.extract_strided_slice %155 {offsets = [32, 0], sizes = [32, 32], strides = [1, 1]} : vector<224x32xf32> to vector<32x32xf32>
    %cst_67 = arith.constant dense<0.000000e+00> : vector<32x32xf32>
    %161 = tpu.matmul %160, %159, %cst_67 {dimension_numbers = #tpu.dot_dimension_numbers<[1], [1], [0], [0], [0, 0, 1, 0], [], []>} : vector<32x32xf32>, vector<32x32xf32>, vector<32x32xf32> -> vector<32x32xf32>
    %162 = arith.addf %158, %161 : vector<32x32xf32>
    %c704 = arith.constant 704 : index
    %c0_68 = arith.constant 0 : index
    %163 = vector.load %arg2[%c704, %c0_68] : memref<1232x32xf32, #tpu.memory_space<vmem>>, vector<32x32xf32>
    %164 = vector.extract_strided_slice %155 {offsets = [64, 0], sizes = [32, 32], strides = [1, 1]} : vector<224x32xf32> to vector<32x32xf32>
    %cst_69 = arith.constant dense<0.000000e+00> : vector<32x32xf32>
    %165 = tpu.matmul %164, %163, %cst_69 {dimension_numbers = #tpu.dot_dimension_numbers<[1], [1], [0], [0], [0, 0, 1, 0], [], []>} : vector<32x32xf32>, vector<32x32xf32>, vector<32x32xf32> -> vector<32x32xf32>
    %166 = arith.addf %162, %165 : vector<32x32xf32>
    %c736 = arith.constant 736 : index
    %c0_70 = arith.constant 0 : index
    %167 = vector.load %arg2[%c736, %c0_70] : memref<1232x32xf32, #tpu.memory_space<vmem>>, vector<32x32xf32>
    %168 = vector.extract_strided_slice %155 {offsets = [96, 0], sizes = [32, 32], strides = [1, 1]} : vector<224x32xf32> to vector<32x32xf32>
    %cst_71 = arith.constant dense<0.000000e+00> : vector<32x32xf32>
    %169 = tpu.matmul %168, %167, %cst_71 {dimension_numbers = #tpu.dot_dimension_numbers<[1], [1], [0], [0], [0, 0, 1, 0], [], []>} : vector<32x32xf32>, vector<32x32xf32>, vector<32x32xf32> -> vector<32x32xf32>
    %170 = arith.addf %166, %169 : vector<32x32xf32>
    %c768 = arith.constant 768 : index
    %c0_72 = arith.constant 0 : index
    %171 = vector.load %arg2[%c768, %c0_72] : memref<1232x32xf32, #tpu.memory_space<vmem>>, vector<32x32xf32>
    %172 = vector.extract_strided_slice %155 {offsets = [128, 0], sizes = [32, 32], strides = [1, 1]} : vector<224x32xf32> to vector<32x32xf32>
    %cst_73 = arith.constant dense<0.000000e+00> : vector<32x32xf32>
    %173 = tpu.matmul %172, %171, %cst_73 {dimension_numbers = #tpu.dot_dimension_numbers<[1], [1], [0], [0], [0, 0, 1, 0], [], []>} : vector<32x32xf32>, vector<32x32xf32>, vector<32x32xf32> -> vector<32x32xf32>
    %174 = arith.addf %170, %173 : vector<32x32xf32>
    %c800 = arith.constant 800 : index
    %c0_74 = arith.constant 0 : index
    %175 = vector.load %arg2[%c800, %c0_74] : memref<1232x32xf32, #tpu.memory_space<vmem>>, vector<32x32xf32>
    %176 = vector.extract_strided_slice %155 {offsets = [160, 0], sizes = [32, 32], strides = [1, 1]} : vector<224x32xf32> to vector<32x32xf32>
    %cst_75 = arith.constant dense<0.000000e+00> : vector<32x32xf32>
    %177 = tpu.matmul %176, %175, %cst_75 {dimension_numbers = #tpu.dot_dimension_numbers<[1], [1], [0], [0], [0, 0, 1, 0], [], []>} : vector<32x32xf32>, vector<32x32xf32>, vector<32x32xf32> -> vector<32x32xf32>
    %178 = arith.addf %174, %177 : vector<32x32xf32>
    %c832 = arith.constant 832 : index
    %c0_76 = arith.constant 0 : index
    %179 = vector.load %arg2[%c832, %c0_76] : memref<1232x32xf32, #tpu.memory_space<vmem>>, vector<32x32xf32>
    %180 = vector.extract_strided_slice %155 {offsets = [192, 0], sizes = [32, 32], strides = [1, 1]} : vector<224x32xf32> to vector<32x32xf32>
    %cst_77 = arith.constant dense<0.000000e+00> : vector<32x32xf32>
    %181 = tpu.matmul %180, %179, %cst_77 {dimension_numbers = #tpu.dot_dimension_numbers<[1], [1], [0], [0], [0, 0, 1, 0], [], []>} : vector<32x32xf32>, vector<32x32xf32>, vector<32x32xf32> -> vector<32x32xf32>
    %182 = arith.addf %178, %181 : vector<32x32xf32>
    %183 = vector.extract_strided_slice %9 {offsets = [9, 0], sizes = [1, 32], strides = [1, 1]} : vector<16x32xf32> to vector<1x32xf32>
    %184 = vector.broadcast %183 : vector<1x32xf32> to vector<32x32xf32>
    %185 = arith.addf %182, %184 : vector<32x32xf32>
    %cst_78 = arith.constant 0.000000e+00 : f32
    %186 = vector.broadcast %cst_78 : f32 to vector<32x32xf32>
    %187 = arith.maximumf %185, %186 : vector<32x32xf32>
    %188 = vector.extract_strided_slice %187 {offsets = [0, 0], sizes = [16, 32], strides = [1, 1]} : vector<32x32xf32> to vector<16x32xf32>
    %cst_79 = arith.constant dense<0.000000e+00> : vector<32xf32>
    %189 = vector.multi_reduction <add>, %188, %cst_79 [0] : vector<16x32xf32> to vector<32xf32>
    %190 = vector.shape_cast %189 : vector<32xf32> to vector<1x32xf32>
    %191 = vector.extract_strided_slice %187 {offsets = [16, 0], sizes = [16, 32], strides = [1, 1]} : vector<32x32xf32> to vector<16x32xf32>
    %cst_80 = arith.constant dense<0.000000e+00> : vector<32xf32>
    %192 = vector.multi_reduction <add>, %191, %cst_80 [0] : vector<16x32xf32> to vector<32xf32>
    %193 = vector.shape_cast %192 : vector<32xf32> to vector<1x32xf32>
    %cst_81 = arith.constant 0.000000e+00 : f32
    %194 = vector.broadcast %cst_81 : f32 to vector<6x32xf32>
    %195 = tpu.concatenate %190, %193, %194 in 0 : vector<1x32xf32>, vector<1x32xf32>, vector<6x32xf32> -> vector<8x32xf32>
    %cst_82 = arith.constant 6.250000e-02 : f32
    %196 = vector.broadcast %cst_82 : f32 to vector<8x32xf32>
    %197 = arith.mulf %195, %196 : vector<8x32xf32>
    %cst_83 = arith.constant dense<0.000000e+00> : vector<8x32xf32>
    %198 = tpu.matmul %197, %6, %cst_83 {dimension_numbers = #tpu.dot_dimension_numbers<[1], [1], [0], [0], [0, 0, 1, 0], [], []>} : vector<8x32xf32>, vector<32x32xf32>, vector<8x32xf32> -> vector<8x32xf32>
    %199 = vector.broadcast %17 : vector<1x32xf32> to vector<8x32xf32>
    %200 = arith.addf %198, %199 : vector<8x32xf32>
    %cst_84 = arith.constant 0.000000e+00 : f32
    %201 = vector.broadcast %cst_84 : f32 to vector<8x32xf32>
    %202 = arith.maximumf %200, %201 : vector<8x32xf32>
    %cst_85 = arith.constant dense<0.000000e+00> : vector<8x128xf32>
    %203 = tpu.matmul %202, %19, %cst_85 {dimension_numbers = #tpu.dot_dimension_numbers<[1], [0], [0], [1], [0, 0, 1, 1], [], []>} : vector<8x32xf32>, vector<32x128xf32>, vector<8x128xf32> -> vector<8x128xf32>
    %204 = vector.broadcast %20 : vector<1x128xf32> to vector<8x128xf32>
    %205 = arith.addf %203, %204 : vector<8x128xf32>
    %c0_86 = arith.constant 0 : index
    %c0_87 = arith.constant 0 : index
    %206 = vector.load %arg4[%c0_86, %c0_87] : memref<8x128xf32, #tpu.memory_space<vmem>>, vector<8x128xf32>
    tpu.vector_store %arg4[%c0_86, %c0_87], %205 {strides = array<i32>} : memref<8x128xf32, #tpu.memory_space<vmem>>, vector<8x128xf32>,
    return
  }
  func.func @transform_0(%arg0: i32) -> (i32, i32) {
    %c0_i32 = arith.constant 0 : i32
    %c0_i32_0 = arith.constant 0 : i32
    %c0_i32_1 = arith.constant 0 : i32
    return %c0_i32, %c0_i32_0 : i32, i32
  }
  func.func @transform_1(%arg0: i32) -> (i32, i32) {
    %c0_i32 = arith.constant 0 : i32
    %c0_i32_0 = arith.constant 0 : i32
    %c0_i32_1 = arith.constant 0 : i32
    return %c0_i32, %c0_i32_0 : i32, i32
  }
  func.func @transform_2(%arg0: i32) -> (i32, i32) {
    %c0_i32 = arith.constant 0 : i32
    %c0_i32_0 = arith.constant 0 : i32
    %c0_i32_1 = arith.constant 0 : i32
    return %c0_i32, %c0_i32_0 : i32, i32
  }
  func.func @transform_3(%arg0: i32) -> (i32, i32) {
    %c0_i32 = arith.constant 0 : i32
    %c0_i32_0 = arith.constant 0 : i32
    %c0_i32_1 = arith.constant 0 : i32
    return %c0_i32, %c0_i32_0 : i32, i32
  }
}

</mosaic_0001>

<bundles_post_ra>
// kernel: fwd.1
= control target key start
LH: loop header
LB: loop body
LE: loop exit
PB: predicated region body
PF: predicated region fallthrough
CT: control target
= control target key end

     0   :  { %8 = vsyncpa [#allocation3], 0  ;;  %s7476_s0 = inlined_call_operand.vmem [shape: f32[32,32], index: 0, kind: input, shape index: {}]   ;;  %s7477_s1 = inlined_call_operand.hbm [shape: f32[1232,32], index: 1, kind: input, shape index: {}]   ;;  %s7478_s2 = inlined_call_operand.hbm [shape: f32[168,128], index: 2, kind: input, shape index: {}]   ;;  %s7479_s3 = inlined_call_operand.vmem [shape: f32[8,128], index: 3, kind: output, shape index: {}]  }
   0x1   :  { %9 = vsyncpa [#allocation5], 0  ;;  %s6580_s12 = smov [#allocation2]   ;;  %s6532_s16 = scalar_lea.hbm %s7477_s1, 19712 }
   0x2   :  { %s17_s13 = sshll.u32 %s6580_s12, 4  ;;  %p6533_p0 = scmp.ne.s32.totalorder %s7477_s1, %s6532_s16  ;;  %s18_s13 = int_to_ptr.vmem [resolvable:$true] %s17_s13 }
   0x3   :  { %p6536_p1 = scmp.lt.u32.totalorder %s6532_s16, %s7477_s1 }
   0x5   :  { %p6538_p2 = pnand %p6536_p1, %p6533_p0 }
   0x7   :  { %6541 = shalt.err (!%p6538_p2)
}
   0x8   :  { %s6542_s21 = scalar_lea.vmem %s18_s13, 19712  ;;  %p6547_p4 = scmp.lt.s32.totalorder %s18_s13, %s18_s13 }
   0x9   :  { %p6543_p3 = scmp.ne.s32.totalorder %s18_s13, %s6542_s21  ;;  %p6548_p5 = scmp.lt.s32.totalorder %s6542_s21, %s6542_s21 }
   0xb   :  { %p6549_p6 = por %p6548_p5, %p6547_p4 }
   0xd   :  { %p6550_p7 = pnand %p6549_p6, %p6543_p3 }
   0xf   :  { %6553 = shalt.err (!%p6550_p7)
}
  0x10   :  { %s6581_s22 = smov 128   ;;  %s6582_s23 = smov 8  }
  0x11   :  { %23 = dma.hbm_to_vmem [thread:$0]  %s7477_s1, 19712, %s18_s13, [#allocation3], %s6581_s22, %s6581_s22, %s6582_s23  }
  0x12   :  { %s6583_s26 = smov [#allocation4]   ;;  %s6554_s30 = scalar_lea.hbm %s7478_s2, 2688 }
  0x13   :  { %s29_s27 = sshll.u32 %s6583_s26, 4  ;;  %p6555_p8 = scmp.ne.s32.totalorder %s7478_s2, %s6554_s30  ;;  %s30_s27 = int_to_ptr.vmem [resolvable:$true] %s29_s27 }
  0x14   :  { %p6558_p9 = scmp.lt.u32.totalorder %s6554_s30, %s7478_s2 }
  0x16   :  { %p6560_p10 = pnand %p6558_p9, %p6555_p8 }
  0x18   :  { %6563 = shalt.err (!%p6560_p10)
}
  0x19   :  { %s6564_s8 = scalar_lea.vmem %s30_s27, 2688  ;;  %p6569_p12 = scmp.lt.s32.totalorder %s30_s27, %s30_s27 }
  0x1a   :  { %p6565_p11 = scmp.ne.s32.totalorder %s30_s27, %s6564_s8  ;;  %p6570_p13 = scmp.lt.s32.totalorder %s6564_s8, %s6564_s8 }
  0x1c   :  { %p6571_p0 = por %p6570_p13, %p6569_p12 }
  0x1e   :  { %p6572_p1 = pnand %p6571_p0, %p6565_p11 }
  0x20   :  { %6575 = shalt.err (!%p6572_p1)
}
  0x21   :  { %35 = dma.hbm_to_vmem [thread:$0]  %s7478_s2, 2688, %s30_s27, [#allocation5], %s6581_s22, %s6581_s22, %s6582_s23  }
  0x22   :  { %6576 = dma.done.wait [#allocation3], 19712  }
  0x23   :  { %6577 = vsyncadd [#allocation3], 4294947584 }
  0x24   :  { %6578 = dma.done.wait [#allocation5], 2688  }
  0x25   :  { %6579 = vsyncadd [#allocation5], 4294964608  ;;  %vm141_vm0 = vcmask 261120   ;;  %v46_v1 = vld [vmem:[#allocation2] sm:$0xff]  ;;  %v47_v2 = vld [vmem:[#allocation2 + $0x8] sm:$0xff]  ;;  %v137_v26 = vlaneseq  ;;  %vm6585_vm2 = vmmov 0  }
  0x26   :  { %vm6633_vm1 = vmpackc.low %vm141_vm0, %vm141_vm0  ;;  %v48_v3 = vld [vmem:[#allocation2 + $0x10] sm:$0xff]  ;;  %v5934_v4 = vpack.c.bf16 %v47_v2, %v46_v1  ;;  %v49_v5 = vld [vmem:[#allocation2 + $0x18] sm:$0xff]  ;;  %vm4440_vm3 = vcmask 1040384   ;;  %vm4442_vm4 = vcmask 1041408  }
  0x27   :  { %v42_v6 = vld [vmem:[%s7476_s0] sm:$0xff]  ;;  %v5940_v7 = vpack.c.bf16 %v49_v5, %v48_v3  ;;  %v51_v9 = vld [vmem:[#allocation2 + $0x28] sm:$0xff]  ;;  %v52_v11 = vld [vmem:[#allocation2 + $0x30] sm:$0xff]  ;;  %v6679_v27 = vshrl.u32 %v137_v26, 7 }
  0x28   :  { %5312 = vmatprep.mubr.msk.f32.mxu0 %vm141_vm0, %v42_v6  ;;  %v50_v8 = vld [vmem:[#allocation2 + $0x20] sm:$0xff]  ;;  %5936 = vmatprep.subr.msk.bf16.mxu0 %vm6633_vm1, %v5934_v4  ;;  %v53_v12 = vld [vmem:[#allocation2 + $0x38] sm:$0xff]  ;;  %v55_v15 = vld [vmem:[#allocation2 + $0x48] sm:$0xff] }
  0x29   :  { %5939 = vmatpush3.bf16.xpose.msk.msra.mxu0 %vm6633_vm1, %v5934_v4  ;;  %v5946_v10 = vpack.c.bf16 %v51_v9, %v50_v8  ;;  %v5952_v13 = vpack.c.bf16 %v53_v12, %v52_v11  ;;  %v54_v14 = vld [vmem:[#allocation2 + $0x40] sm:$0xff]  ;;  %v56_v17 = vld [vmem:[#allocation2 + $0x50] sm:$0xff]  ;;  %v57_v18 = vld [vmem:[#allocation2 + $0x58] sm:$0xff]  ;;  %v139_v28 = vsub.s32 0, %v6679_v27  ;;  %v253_v42 = vsub.s32 1, %v6679_v27 }
  0x2a   :  { %5942 = vmatprep.subr.msk.bf16.mxu0 %vm6633_vm1, %v5940_v7  ;;  %v5958_v16 = vpack.c.bf16 %v55_v15, %v54_v14  ;;  %v43_v19 = vld [vmem:[%s7476_s0 + $0x8] sm:$0xff]  ;;  %v44_v20 = vld [vmem:[%s7476_s0 + $0x10] sm:$0xff]  ;;  %v5964_v21 = vpack.c.bf16 %v57_v18, %v56_v17  ;;  %v45_v22 = vld [vmem:[%s7476_s0 + $0x18] sm:$0xff]  ;;  %v370_v43 = vsub.s32 2, %v6679_v27 }
  0x2b   :  { %5948 = vmatprep.subr.msk.bf16.mxu1 %vm6633_vm1, %v5946_v10  ;;  %v58_v23 = vld [vmem:[#allocation2 + $0x60] sm:$0xff]  ;;  %v59_v24 = vld [vmem:[#allocation2 + $0x68] sm:$0xff]  ;;  %v60_v32 = vld [vmem:[#allocation2 + $0x70] sm:$0xff] }
  0x2c   :  { %5951 = vmatpush3.bf16.xpose.msk.msra.mxu1 %vm6633_vm1, %v5946_v10  ;;  %v5970_v25 = vpack.c.bf16 %v59_v24, %v58_v23  ;;  %v6682_v29 = vld [vmem:[#allocation2 + $0x4c0] sm:$0xff]  ;;  %v61_v33 = vld [vmem:[#allocation2 + $0x78] sm:$0xff]  ;;  %v6733_v47 = vld [vmem:[#allocation2 + $0x368] sm:$0xff] }
  0x2d   :  { %5954 = vmatprep.subr.msk.bf16.mxu1 %vm6633_vm1, %v5952_v13  ;;  %v140_v30 = vrot.slane %v6682_v29, %v139_v28  ;;  %v5976_v37 = vpack.c.bf16 %v61_v33, %v60_v32  ;;  %v254_v44 = vrot.slane %v6682_v29, %v253_v42  ;;  %v371_v45 = vrot.slane %v6682_v29, %v370_v43  ;;  %v6735_v48 = vld [vmem:[#allocation2 + $0x388] sm:$0xff]  ;;  %v6741_v54 = vld [vmem:[#allocation2 + $0x360] sm:$0xff]  ;;  %v77_v8 = vld [vmem:[#allocation2 + $0x398] sm:$0xff] }
  0x2e   :  { %v6737_v49 = vld [vmem:[#allocation2 + $0x3a8] sm:$0xff]  ;;  %v6743_v55 = vld [vmem:[#allocation2 + $0x380] sm:$0xff]  ;;  %v76_v14 = vld [vmem:[#allocation2 + $0x390] sm:$0xff] }
  0x2f   :  { %v6745_v56 = vld [vmem:[#allocation2 + $0x3a0] sm:$0xff]  ;;  %v83_v61 = vld [vmem:[#allocation2 + $0x3c8] sm:$0xff]  ;;  %v81_v23 = vld [vmem:[#allocation2 + $0x3b8] sm:$0xff] }
  0x30   :  { %v6747_v60 = vld [vmem:[#allocation2 + $0x3c0] sm:$0xff]  ;;  %v84_v24 = vld [vmem:[#allocation2 + $0x3d0] sm:$0xff] }
  0x31   :  { %5945 = vmatpush3.bf16.xpose.msk.msra.mxu0 %vm6633_vm1, %v5940_v7  ;;  %v73_v7 = vld [vmem:[#allocation2 + $0x378] sm:$0xff] }
  0x32   :  { %5960 = vmatprep.subr.msk.bf16.mxu0 %vm6633_vm1, %v5958_v16 }
  0x34   :  { %5957 = vmatpush3.bf16.xpose.msk.msra.mxu1 %vm6633_vm1, %v5952_v13  ;;  %v72_v13 = vld [vmem:[#allocation2 + $0x370] sm:$0xff] }
  0x35   :  { %5972 = vmatprep.subr.msk.bf16.mxu1 %vm6633_vm1, %v5970_v25 }
  0x38   :  { %5313 = vmatmul.mubr.msk.f32.vlgmr.msra.gmra.mrb[0].mxu0 %vm141_vm0, %v43_v19 }
  0x39   :  { %5315 = vmatprep.mubr.msk.f32.mxu0 %vm141_vm0, %v44_v20  ;;  %5963 = vmatpush3.bf16.xpose.msk.msra.mxu0 %vm6633_vm1, %v5958_v16  ;;  %v80_v16 = vld [vmem:[#allocation2 + $0x3b0] sm:$0xff] }
  0x3a   :  { %5966 = vmatprep.subr.msk.bf16.mxu0 %vm6633_vm1, %v5964_v21 }
  0x3c   :  { %5316 = vmatmul.mubr.msk.f32.gmra.mrb[2].mxu0 %vm141_vm0, %v45_v22 }
  0x41   :  { %5969 = vmatpush3.bf16.xpose.msk.msra.mxu0 %vm6633_vm1, %v5964_v21 }
 0x10b   :  { %v5314_v31 = vpop.f32.mrb[0].mxu0 }
 0x10c   :  { %v232_v34 = vpop.f32.mrb[1].mxu0  ;;  %v6689_v36 = vadd.f32 %v5314_v31, %v140_v30 }
 0x10d   :  { %v6687_v35 = vadd.f32 %v232_v34, %v140_v30  ;;  %v471_v34 = vsub.s32 3, %v6679_v27 }
 0x10f   :  { %v5317_v38 = vpop.f32.mrb[2].mxu0  ;;  %5326 = vmatprep.mubr.msk.f32.mxu1 %vm141_vm0, %v6687_v35  ;;  %5340 = vmatprep.mubr.msk.f32.mxu0 %vm141_vm0, %v6687_v35 }
 0x110   :  { %v6695_v39 = vadd.f32 %v5317_v38, %v140_v30  ;;  %v242_v40 = vpop.f32.mrb[3].mxu0  ;;  %5327 = vmatmul.mubr.msk.f32.vlgmr.msra.gmra.mrb[0].mxu1 %vm141_vm0, %v6689_v36  ;;  %5341 = vmatmul.mubr.msk.f32.vlgmr.msra.gmra.mrb[4].mxu0 %vm141_vm0, %v6689_v36 }
 0x111   :  { %v6701_v41 = vadd.f32 %v242_v40, %v140_v30  ;;  %5975 = vmatpush3.bf16.xpose.msk.msra.mxu1 %vm6633_vm1, %v5970_v25  ;;  %v85_v25 = vld [vmem:[#allocation2 + $0x3d8] sm:$0xff] }
 0x112   :  { %5978 = vmatprep.subr.msk.bf16.mxu1 %vm6633_vm1, %v5976_v37 }
 0x113   :  { %5329 = vmatprep.mubr.msk.f32.mxu1 %vm141_vm0, %v6701_v41  ;;  %5343 = vmatprep.mubr.msk.f32.mxu0 %vm141_vm0, %v6701_v41 }
 0x114   :  { %5330 = vmatmul.mubr.msk.f32.gmra.mrb[2].mxu1 %vm141_vm0, %v6695_v39  ;;  %5344 = vmatmul.mubr.msk.f32.gmra.mrb[6].mxu0 %vm141_vm0, %v6695_v39 }
 0x115   :  { %5354 = vmatprep.mubr.msk.f32.mxu1 %vm141_vm0, %v6687_v35 }
 0x119   :  { %5981 = vmatpush3.bf16.xpose.msk.msra.mxu1 %vm6633_vm1, %v5976_v37 }
 0x120   :  { %5355 = vmatmul.mubr.msk.f32.vlgmr.msra.gmra.mrb[4].mxu1 %vm141_vm0, %v6689_v36 }
 0x121   :  { %5357 = vmatprep.mubr.msk.f32.mxu1 %vm141_vm0, %v6701_v41 }
 0x124   :  { %5358 = vmatmul.mubr.msk.f32.gmra.mrb[6].mxu1 %vm141_vm0, %v6695_v39 }
 0x1e3   :  { %v5328_v46 = vpop.f32.mrb[0].mxu1  ;;  %v5342_v50 = vpop.f32.mrb[4].mxu0 }
 0x1e4   :  { %v6739_v51 = vadd.f32 %v5328_v46, %v254_v44  ;;  %v456_v52 = vadd.f32 %v5342_v50, %v371_v45  ;;  %v345_v53 = vpop.f32.mrb[1].mxu1  ;;  %v450_v57 = vpop.f32.mrb[5].mxu0 }
 0x1e5   :  { %v346_v58 = vadd.f32 %v345_v53, %v254_v44  ;;  %v451_v59 = vadd.f32 %v450_v57, %v371_v45  ;;  %v472_v57 = vrot.slane %v6682_v29, %v471_v34 }
 0x1e6   :  { %v571_v62 = vmul.f32 %v456_v52, %v6733_v47  ;;  %v575_v63 = vmul.f32 %v456_v52, %v6735_v48  ;;  %v579_v1 = vmul.f32 %v456_v52, %v6737_v49  ;;  %v583_v18 = vmul.f32 %v456_v52, %v83_v61 }
 0x1e7   :  { %v364_v2 = vmul.f32 0.35355338, %v346_v58  ;;  %v570_v3 = vmul.f32 %v451_v59, %v6741_v54  ;;  %v574_v4 = vmul.f32 %v451_v59, %v6743_v55  ;;  %v578_v5 = vmul.f32 %v451_v59, %v6745_v56  ;;  %v5331_v6 = vpop.f32.mrb[2].mxu1  ;;  %v5345_v9 = vpop.f32.mrb[6].mxu0 }
 0x1e8   :  { %v6755_v10 = vadd.f32 %v5331_v6, %v254_v44  ;;  %v466_v11 = vadd.f32 %v5345_v9, %v371_v45  ;;  %v355_v12 = vpop.f32.mrb[3].mxu1  ;;  %v460_v15 = vpop.f32.mrb[7].mxu0  ;;  %v582_v17 = vmul.f32 %v451_v59, %v6747_v60 }
 0x1e9   :  { %v6758_v19 = vadd.f32 %v355_v12, %v254_v44  ;;  %v461_v20 = vadd.f32 %v460_v15, %v371_v45  ;;  %5392 = vmatprep.mubr.msk.f32.mxu0 %vm141_vm0, %v364_v2  ;;  %v5982_v21 = vpack.c.bf16 %v571_v62, %v570_v3  ;;  %v5994_v22 = vpack.c.bf16 %v575_v63, %v574_v4 }
 0x1ea   :  { %v573_v26 = vmul.f32 %v466_v11, %v73_v7  ;;  %v577_v30 = vmul.f32 %v466_v11, %v77_v8  ;;  %v6761_v31 = vpack.c.bf16 %v579_v1, %v578_v5  ;;  %v581_v38 = vmul.f32 %v466_v11, %v81_v23 }
 0x1eb   :  { %v572_v32 = vmul.f32 %v461_v20, %v72_v13  ;;  %v576_v33 = vmul.f32 %v461_v20, %v76_v14  ;;  %5984 = vmatprep.subr.msk.bf16.mxu0 %vm6633_vm1, %v5982_v21  ;;  %v580_v37 = vmul.f32 %v461_v20, %v80_v16  ;;  %v584_v40 = vmul.f32 %v461_v20, %v84_v24 }
 0x1ec   :  { %5987 = vmatpush3.bf16.xpose.msk.msra.mxu0 %vm6633_vm1, %v5982_v21  ;;  %v585_v44 = vmul.f32 %v466_v11, %v85_v25  ;;  %v6768_v45 = vpack.c.bf16 %v583_v18, %v582_v17 }
 0x1ed   :  { %v5988_v46 = vpack.c.bf16 %v573_v26, %v572_v32  ;;  %v6000_v50 = vpack.c.bf16 %v577_v30, %v576_v33  ;;  %v6012_v52 = vpack.c.bf16 %v581_v38, %v580_v37 }
 0x1ee   :  { %v6770_v53 = vpack.c.bf16 %v585_v44, %v584_v40  ;;  %v119_v44 = vld [vmem:[#allocation4 + $0x18] sm:$0xff] }
 0x1ef   :  { %5990 = vmatprep.subr.msk.bf16.mxu0 %vm6633_vm1, %v5988_v46 }
 0x1f3   :  { %v5356_v58 = vpop.f32.mrb[4].mxu1 }
 0x1f4   :  { %v557_v59 = vadd.f32 %v5356_v58, %v472_v57  ;;  %v551_v62 = vpop.f32.mrb[5].mxu1  ;;  %5993 = vmatpush3.bf16.xpose.msk.msra.mxu0 %vm6633_vm1, %v5988_v46  ;;  %v123_v58 = vld [vmem:[#allocation4 + $0x38] sm:$0xff] }
 0x1f5   :  { %v552_v63 = vadd.f32 %v551_v62, %v472_v57  ;;  %5996 = vmatprep.subr.msk.bf16.mxu0 %vm6633_vm1, %v5994_v22 }
 0x1f6   :  { %v587_v1 = vmul.f32 %v557_v59, %v6733_v47  ;;  %v591_v2 = vmul.f32 %v557_v59, %v6735_v48  ;;  %v595_v3 = vmul.f32 %v557_v59, %v6737_v49  ;;  %v599_v4 = vmul.f32 %v557_v59, %v83_v61 }
 0x1f7   :  { %v5359_v5 = vpop.f32.mrb[6].mxu1  ;;  %v586_v6 = vmul.f32 %v552_v63, %v6741_v54  ;;  %v590_v9 = vmul.f32 %v552_v63, %v6743_v55  ;;  %v594_v11 = vmul.f32 %v552_v63, %v6745_v56  ;;  %v598_v12 = vmul.f32 %v552_v63, %v6747_v60  ;;  %v126_v63 = vld [vmem:[#allocation4 + $0x50] sm:$0xff] }
 0x1f8   :  { %v567_v15 = vadd.f32 %v5359_v5, %v472_v57  ;;  %v561_v17 = vpop.f32.mrb[7].mxu1  ;;  %v127_v5 = vld [vmem:[#allocation4 + $0x58] sm:$0xff] }
 0x1f9   :  { %v562_v18 = vadd.f32 %v561_v17, %v472_v57  ;;  %v6030_v20 = vpack.c.bf16 %v587_v1, %v586_v6  ;;  %v6038_v21 = vpack.c.bf16 %v591_v2, %v590_v9  ;;  %v6046_v47 = vpack.c.bf16 %v595_v3, %v594_v11  ;;  %v124_v57 = vld [vmem:[#allocation4 + $0x40] sm:$0xff]  ;;  %v125_v1 = vld [vmem:[#allocation4 + $0x48] sm:$0xff]  ;;  %v130_v11 = vld [vmem:[#allocation4 + $0x70] sm:$0xff] }
 0x1fa   :  { %v589_v26 = vmul.f32 %v567_v15, %v73_v7  ;;  %v593_v48 = vmul.f32 %v567_v15, %v77_v8  ;;  %v597_v30 = vmul.f32 %v567_v15, %v81_v23  ;;  %v6054_v49 = vpack.c.bf16 %v599_v4, %v598_v12  ;;  %v128_v4 = vld [vmem:[#allocation4 + $0x60] sm:$0xff]  ;;  %v129_v12 = vld [vmem:[#allocation4 + $0x68] sm:$0xff] }
 0x1fb   :  { %6031 = vmatprep.subr.bf16.mxu1 %v6030_v20  ;;  %v588_v61 = vmul.f32 %v562_v18, %v72_v13  ;;  %v592_v32 = vmul.f32 %v562_v18, %v76_v14  ;;  %v596_v54 = vmul.f32 %v562_v18, %v80_v16  ;;  %v600_v33 = vmul.f32 %v562_v18, %v84_v24  ;;  %v116_v16 = vld [vmem:[#allocation4] sm:$0xff]  ;;  %v131_v18 = vld [vmem:[#allocation4 + $0x78] sm:$0xff] }
 0x1fc   :  { %6033 = vmatpush3.bf16.msra.mxu1 %v6030_v20  ;;  %5999 = vmatpush3.bf16.xpose.msk.msra.mxu0 %vm6633_vm1, %v5994_v22  ;;  %v601_v55 = vmul.f32 %v567_v15, %v85_v25  ;;  %v365_v8 = vmul.f32 0.35355338, %v6739_v51  ;;  %v366_v13 = vmul.f32 0.35355338, %v6758_v19  ;;  %v367_v14 = vmul.f32 0.35355338, %v6755_v10 }
 0x1fd   :  { %6002 = vmatprep.subr.msk.bf16.mxu0 %vm6633_vm1, %v6000_v50  ;;  %v6034_v56 = vpack.c.bf16 %v589_v26, %v588_v61  ;;  %v6042_v60 = vpack.c.bf16 %v593_v48, %v592_v32  ;;  %v6050_v34 = vpack.c.bf16 %v597_v30, %v596_v54  ;;  %v117_v25 = vld [vmem:[#allocation4 + $0x8] sm:$0xff]  ;;  %v120_v19 = vld [vmem:[#allocation4 + $0x20] sm:$0xff]  ;;  %v122_v10 = vld [vmem:[#allocation4 + $0x30] sm:$0xff] }
 0x1fe   :  { %v6058_v7 = vpack.c.bf16 %v601_v55, %v600_v33 }
 0x1ff   :  { %6035 = vmatprep.subr.bf16.mxu1 %v6034_v56 }
 0x200   :  { %6037 = vmatpush3.bf16.msra.mxu1 %v6034_v56 }
 0x201   :  { %6039 = vmatprep.subr.bf16.mxu1 %v6038_v21 }
 0x204   :  { %6041 = vmatpush3.bf16.msra.mxu1 %v6038_v21  ;;  %6005 = vmatpush3.bf16.xpose.msk.msra.mxu0 %vm6633_vm1, %v6000_v50  ;;  %v121_v50 = vld [vmem:[#allocation4 + $0x28] sm:$0xff] }
 0x205   :  { %6043 = vmatprep.subr.bf16.mxu1 %v6042_v60  ;;  %6008 = vmatprep.subr.msk.bf16.mxu0 %vm6633_vm1, %v6761_v31 }
 0x208   :  { %6045 = vmatpush3.bf16.msra.mxu1 %v6042_v60 }
 0x209   :  { %6047 = vmatprep.subr.bf16.mxu1 %v6046_v47 }
 0x20c   :  { %6049 = vmatpush3.bf16.msra.mxu1 %v6046_v47  ;;  %6011 = vmatpush3.bf16.xpose.msk.msra.mxu0 %vm6633_vm1, %v6761_v31  ;;  %v118_v31 = vld [vmem:[#allocation4 + $0x10] sm:$0xff] }
 0x20d   :  { %6051 = vmatprep.subr.bf16.mxu1 %v6050_v34  ;;  %6014 = vmatprep.subr.msk.bf16.mxu0 %vm6633_vm1, %v6012_v52 }
 0x210   :  { %6053 = vmatpush3.bf16.msra.mxu1 %v6050_v34 }
 0x211   :  { %6055 = vmatprep.subr.bf16.mxu1 %v6054_v49 }
 0x214   :  { %6057 = vmatpush3.bf16.msra.mxu1 %v6054_v49  ;;  %6017 = vmatpush3.bf16.xpose.msk.msra.mxu0 %vm6633_vm1, %v6012_v52 }
 0x215   :  { %6059 = vmatprep.subr.bf16.mxu1 %v6058_v7  ;;  %6020 = vmatprep.subr.msk.bf16.mxu0 %vm6633_vm1, %v6768_v45 }
 0x218   :  { %6061 = vmatpush3.bf16.msra.mxu1 %v6058_v7 }
 0x21c   :  { %6023 = vmatpush3.bf16.xpose.msk.msra.mxu0 %vm6633_vm1, %v6768_v45 }
 0x21d   :  { %6026 = vmatprep.subr.msk.bf16.mxu0 %vm6633_vm1, %v6770_v53 }
 0x224   :  { %6029 = vmatpush3.bf16.xpose.msk.msra.mxu0 %vm6633_vm1, %v6770_v53 }
 0x22b   :  { %5393 = vmatmul.mubr.msk.f32.vlgmr.msra.gmra.mrb[8].mxu0 %vm141_vm0, %v365_v8 }
 0x22c   :  { %5395 = vmatprep.mubr.msk.f32.mxu0 %vm141_vm0, %v366_v13 }
 0x22f   :  { %5396 = vmatmul.mubr.msk.f32.gmra.mrb[10].mxu0 %vm141_vm0, %v367_v14 }
 0x2fe   :  { %v5394_v22 = vpop.f32.mrb[8].mxu0 }
 0x2ff   :  { %v728_v23 = vpop.f32.mrb[9].mxu0  ;;  %v748_v51 = vadd.f32 %v5394_v22, %v117_v25  ;;  %v752_v53 = vadd.f32 %v5394_v22, %v121_v50  ;;  %v6822_v3 = vadd.f32 %v5394_v22, %v125_v1  ;;  %v6834_v17 = vadd.f32 %v5394_v22, %v129_v12 }
 0x300   :  { %v747_v24 = vadd.f32 %v728_v23, %v116_v16  ;;  %v751_v45 = vadd.f32 %v728_v23, %v120_v19  ;;  %v755_v59 = vadd.f32 %v728_v23, %v124_v57  ;;  %v6826_v6 = vadd.f32 %v728_v23, %v128_v4 }
 0x302   :  { %763 = vmax.xlane.f32.xlu0 %v747_v24  ;;  %v5397_v37 = vpop.f32.mrb[10].mxu0 }
 0x303   :  { %v738_v38 = vpop.f32.mrb[11].mxu0  ;;  %v750_v46 = vadd.f32 %v5397_v37, %v119_v44  ;;  %v754_v62 = vadd.f32 %v5397_v37, %v123_v58  ;;  %v6828_v9 = vadd.f32 %v5397_v37, %v127_v5  ;;  %v6838_v20 = vadd.f32 %v5397_v37, %v131_v18 }
 0x304   :  { %v749_v40 = vadd.f32 %v738_v38, %v118_v31  ;;  %v753_v52 = vadd.f32 %v738_v38, %v122_v10  ;;  %v6820_v2 = vadd.f32 %v738_v38, %v126_v63  ;;  %v6832_v15 = vadd.f32 %v738_v38, %v130_v11 }
 0x306   :  { %765 = vmax.xlane.f32.xlu0 %v748_v51  ;;  %767 = vmax.xlane.f32.xlu1 %v749_v40 }
 0x30a   :  { %771 = vmax.xlane.f32.xlu0 %v751_v45  ;;  %769 = vmax.xlane.f32.xlu1 %v750_v46 }
 0x30e   :  { %775 = vmax.xlane.f32.xlu0 %v753_v52  ;;  %773 = vmax.xlane.f32.xlu1 %v752_v53 }
 0x312   :  { %779 = vmax.xlane.f32.xlu0 %v755_v59  ;;  %777 = vmax.xlane.f32.xlu1 %v754_v62 }
 0x316   :  { %783 = vmax.xlane.f32.xlu0 %v6820_v2  ;;  %781 = vmax.xlane.f32.xlu1 %v6822_v3 }
 0x31a   :  { %787 = vmax.xlane.f32.xlu0 %v6826_v6  ;;  %785 = vmax.xlane.f32.xlu1 %v6828_v9 }
 0x31e   :  { %791 = vmax.xlane.f32.xlu0 %v6832_v15  ;;  %789 = vmax.xlane.f32.xlu1 %v6834_v17 }
 0x322   :  { %793 = vmax.xlane.f32.xlu1 %v6838_v20 }
 0x38f   :  { %v764_v21 = vpop.xlane.xlu0 %763 }
 0x390   :  { %v795_v47 = vsub.f32 %v747_v24, %v764_v21 }
 0x392   :  { %v811_v26 = vmul.f32 1.442695, %v795_v47 }
 0x393   :  { %v766_v48 = vpop.xlane.xlu0 %765  ;;  %v768_v30 = vpop.xlane.xlu1 %767 }
 0x394   :  { %6459 = vpow2.f32 %v811_v26  ;;  %v796_v49 = vsub.f32 %v748_v51, %v766_v48  ;;  %v797_v61 = vsub.f32 %v749_v40, %v768_v30 }
 0x396   :  { %v813_v32 = vmul.f32 1.442695, %v796_v49  ;;  %v815_v54 = vmul.f32 1.442695, %v797_v61 }
 0x397   :  { %v772_v33 = vpop.xlane.xlu0 %771  ;;  %v770_v55 = vpop.xlane.xlu1 %769 }
 0x398   :  { %6461 = vpow2.f32 %v813_v32  ;;  %v799_v56 = vsub.f32 %v751_v45, %v772_v33  ;;  %v798_v60 = vsub.f32 %v750_v46, %v770_v55  ;;  %v62_v55 = vld [vmem:[#allocation2 + $0x80] sm:$0xff] }
 0x399   :  { %6463 = vpow2.f32 %v815_v54 }
 0x39a   :  { %v819_v34 = vmul.f32 1.442695, %v799_v56  ;;  %v817_v7 = vmul.f32 1.442695, %v798_v60  ;;  %v63_v56 = vld [vmem:[#allocation2 + $0x88] sm:$0xff] }
 0x39b   :  { %v776_v8 = vpop.xlane.xlu0 %775  ;;  %v774_v13 = vpop.xlane.xlu1 %773  ;;  %v6062_v60 = vpack.c.bf16 %v63_v56, %v62_v55 }
 0x39c   :  { %6465 = vpow2.f32 %v819_v34  ;;  %v801_v14 = vsub.f32 %v753_v52, %v776_v8  ;;  %v800_v16 = vsub.f32 %v752_v53, %v774_v13 }
 0x39d   :  { %6467 = vpow2.f32 %v817_v7  ;;  %6064 = vmatprep.subr.msk.bf16.mxu1 %vm6633_vm1, %v6062_v60 }
 0x39e   :  { %v6841_v22 = vpop.eup %6459  ;;  %v823_v23 = vmul.f32 1.442695, %v801_v14  ;;  %v821_v24 = vmul.f32 1.442695, %v800_v16 }
 0x39f   :  { %843 = vadd.xlane.f32.xlu0 %v6841_v22  ;;  %v780_v25 = vpop.xlane.xlu0 %779  ;;  %v778_v31 = vpop.xlane.xlu1 %777 }
 0x3a0   :  { %6469 = vpow2.f32 %v823_v23  ;;  %v803_v37 = vsub.f32 %v755_v59, %v780_v25  ;;  %v802_v38 = vsub.f32 %v754_v62, %v778_v31  ;;  %v64_v31 = vld [vmem:[#allocation2 + $0x90] sm:$0xff] }
 0x3a1   :  { %6471 = vpow2.f32 %v821_v24 }
 0x3a2   :  { %v6844_v51 = vpop.eup %6461  ;;  %v827_v40 = vmul.f32 1.442695, %v803_v37  ;;  %v825_v19 = vmul.f32 1.442695, %v802_v38  ;;  %v65_v37 = vld [vmem:[#allocation2 + $0x98] sm:$0xff] }
 0x3a3   :  { %v6846_v44 = vpop.eup %6463  ;;  %v784_v45 = vpop.xlane.xlu0 %783  ;;  %845 = vadd.xlane.f32.xlu1 %v6844_v51 }
 0x3a4   :  { %v782_v46 = vpop.xlane.xlu1 %781  ;;  %6473 = vpow2.f32 %v827_v40  ;;  %v805_v10 = vsub.f32 %v6820_v2, %v784_v45  ;;  %847 = vadd.xlane.f32.xlu0 %v6846_v44  ;;  %v6068_v45 = vpack.c.bf16 %v65_v37, %v64_v31 }
 0x3a5   :  { %v804_v50 = vsub.f32 %v6822_v3, %v782_v46  ;;  %6475 = vpow2.f32 %v825_v19 }
 0x3a6   :  { %v6852_v52 = vpop.eup %6465  ;;  %v831_v53 = vmul.f32 1.442695, %v805_v10 }
 0x3a7   :  { %v829_v57 = vmul.f32 1.442695, %v804_v50  ;;  %v6854_v58 = vpop.eup %6467  ;;  %v788_v59 = vpop.xlane.xlu0 %787 }
 0x3a8   :  { %v786_v62 = vpop.xlane.xlu1 %785  ;;  %6477 = vpow2.f32 %v831_v53  ;;  %v807_v63 = vsub.f32 %v6826_v6, %v788_v59  ;;  %851 = vadd.xlane.f32.xlu0 %v6852_v52  ;;  %849 = vadd.xlane.f32.xlu1 %v6854_v58 }
 0x3a9   :  { %v806_v1 = vsub.f32 %v6828_v9, %v786_v62  ;;  %6479 = vpow2.f32 %v829_v57 }
 0x3aa   :  { %v6860_v2 = vpop.eup %6469  ;;  %v835_v3 = vmul.f32 1.442695, %v807_v63 }
 0x3ab   :  { %v833_v4 = vmul.f32 1.442695, %v806_v1  ;;  %v6862_v5 = vpop.eup %6471  ;;  %v792_v11 = vpop.xlane.xlu0 %791 }
 0x3ac   :  { %v790_v12 = vpop.xlane.xlu1 %789  ;;  %6481 = vpow2.f32 %v835_v3  ;;  %v809_v18 = vsub.f32 %v6832_v15, %v792_v11  ;;  %855 = vadd.xlane.f32.xlu0 %v6860_v2  ;;  %853 = vadd.xlane.f32.xlu1 %v6862_v5 }
 0x3ad   :  { %v808_v6 = vsub.f32 %v6834_v17, %v790_v12  ;;  %6483 = vpow2.f32 %v833_v4 }
 0x3ae   :  { %v6868_v9 = vpop.eup %6473  ;;  %v839_v21 = vmul.f32 1.442695, %v809_v18 }
 0x3af   :  { %v837_v47 = vmul.f32 1.442695, %v808_v6  ;;  %v6870_v26 = vpop.eup %6475 }
 0x3b0   :  { %v794_v48 = vpop.xlane.xlu1 %793  ;;  %6485 = vpow2.f32 %v839_v21  ;;  %859 = vadd.xlane.f32.xlu0 %v6868_v9  ;;  %857 = vadd.xlane.f32.xlu1 %v6870_v26 }
 0x3b1   :  { %v810_v15 = vsub.f32 %v6838_v20, %v794_v48  ;;  %6487 = vpow2.f32 %v837_v47 }
 0x3b2   :  { %v6875_v30 = vpop.eup %6477 }
 0x3b3   :  { %v841_v49 = vmul.f32 1.442695, %v810_v15  ;;  %v6877_v17 = vpop.eup %6479 }
 0x3b4   :  { %863 = vadd.xlane.f32.xlu0 %v6875_v30  ;;  %861 = vadd.xlane.f32.xlu1 %v6877_v17 }
 0x3b5   :  { %6489 = vpow2.f32 %v841_v49 }
 0x3b6   :  { %v6881_v61 = vpop.eup %6481 }
 0x3b7   :  { %v6883_v32 = vpop.eup %6483 }
 0x3b8   :  { %867 = vadd.xlane.f32.xlu0 %v6881_v61  ;;  %865 = vadd.xlane.f32.xlu1 %v6883_v32 }
 0x3ba   :  { %v6887_v20 = vpop.eup %6485 }
 0x3bb   :  { %v6889_v54 = vpop.eup %6487 }
 0x3bc   :  { %871 = vadd.xlane.f32.xlu0 %v6887_v20  ;;  %869 = vadd.xlane.f32.xlu1 %v6889_v54 }
 0x3bf   :  { %v6893_v33 = vpop.eup %6489 }
 0x3c0   :  { %873 = vadd.xlane.f32.xlu1 %v6893_v33 }
 0x42c   :  { %v844_v34 = vpop.xlane.xlu0 %843 }
 0x42d   :  { %6491 = vrcp.f32 %v844_v34 }
 0x430   :  { %v846_v7 = vpop.xlane.xlu1 %845 }
 0x431   :  { %v848_v8 = vpop.xlane.xlu0 %847  ;;  %6493 = vrcp.f32 %v846_v7 }
 0x432   :  { %6495 = vrcp.f32 %v848_v8 }
 0x435   :  { %v852_v13 = vpop.xlane.xlu0 %851  ;;  %v850_v14 = vpop.xlane.xlu1 %849 }
 0x436   :  { %6497 = vrcp.f32 %v852_v13 }
 0x437   :  { %v6492_v16 = vpop.eup %6491  ;;  %6499 = vrcp.f32 %v850_v14 }
 0x438   :  { %v891_v23 = vmul.f32 %v6492_v16, %v6841_v22 }
 0x439   :  { %v856_v24 = vpop.xlane.xlu0 %855  ;;  %v854_v25 = vpop.xlane.xlu1 %853 }
 0x43a   :  { %6501 = vrcp.f32 %v856_v24  ;;  %5430 = vmatprep.mubr.f32.mxu1 %v891_v23 }
 0x43b   :  { %v6494_v38 = vpop.eup %6493  ;;  %6503 = vrcp.f32 %v854_v25 }
 0x43c   :  { %v6496_v40 = vpop.eup %6495  ;;  %v892_v19 = vmul.f32 %v6494_v38, %v6844_v51 }
 0x43d   :  { %v860_v46 = vpop.xlane.xlu0 %859  ;;  %v858_v10 = vpop.xlane.xlu1 %857  ;;  %v893_v50 = vmul.f32 %v6496_v40, %v6846_v44 }
 0x43e   :  { %6505 = vrcp.f32 %v860_v46  ;;  %5431 = vmatmul.mubr.f32.vlgmr.msra.gmra.mrb[8].mxu1 %v892_v19 }
 0x43f   :  { %6507 = vrcp.f32 %v858_v10  ;;  %5433 = vmatprep.mubr.f32.mxu1 %v893_v50  ;;  %6067 = vmatpush3.bf16.xpose.msk.msra.mxu1 %vm6633_vm1, %v6062_v60 }
 0x440   :  { %v6498_v22 = vpop.eup %6497  ;;  %6070 = vmatprep.subr.msk.bf16.mxu1 %vm6633_vm1, %v6068_v45 }
 0x441   :  { %v6500_v53 = vpop.eup %6499  ;;  %v864_v57 = vpop.xlane.xlu0 %863  ;;  %v895_v51 = vmul.f32 %v6498_v22, %v6852_v52 }
 0x442   :  { %v862_v59 = vpop.xlane.xlu1 %861  ;;  %6509 = vrcp.f32 %v864_v57  ;;  %v894_v62 = vmul.f32 %v6500_v53, %v6854_v58 }
 0x443   :  { %6511 = vrcp.f32 %v862_v59 }
 0x444   :  { %v6502_v44 = vpop.eup %6501  ;;  %5434 = vmatmul.mubr.f32.gmra.mrb[10].mxu1 %v894_v62 }
 0x445   :  { %v6504_v63 = vpop.eup %6503  ;;  %5436 = vmatprep.mubr.f32.mxu1 %v895_v51  ;;  %v868_v1 = vpop.xlane.xlu0 %867  ;;  %v897_v4 = vmul.f32 %v6502_v44, %v6860_v2 }
 0x446   :  { %v866_v3 = vpop.xlane.xlu1 %865  ;;  %6513 = vrcp.f32 %v868_v1  ;;  %v896_v11 = vmul.f32 %v6504_v63, %v6862_v5 }
 0x447   :  { %6515 = vrcp.f32 %v866_v3  ;;  %6073 = vmatpush3.bf16.xpose.msk.msra.mxu1 %vm6633_vm1, %v6068_v45 }
 0x448   :  { %v6506_v52 = vpop.eup %6505  ;;  %5437 = vmatmul.mubr.f32.gmra.mrb[8].mxu1 %v896_v11 }
 0x449   :  { %v6508_v12 = vpop.eup %6507  ;;  %5439 = vmatprep.mubr.f32.mxu1 %v897_v4  ;;  %v872_v58 = vpop.xlane.xlu0 %871  ;;  %v899_v6 = vmul.f32 %v6506_v52, %v6868_v9 }
 0x44a   :  { %v870_v18 = vpop.xlane.xlu1 %869  ;;  %6517 = vrcp.f32 %v872_v58  ;;  %v898_v21 = vmul.f32 %v6508_v12, %v6870_v26 }
 0x44b   :  { %6519 = vrcp.f32 %v870_v18 }
 0x44c   :  { %v6510_v2 = vpop.eup %6509  ;;  %5440 = vmatmul.mubr.f32.gmra.mrb[10].mxu1 %v898_v21 }
 0x44d   :  { %v6512_v47 = vpop.eup %6511  ;;  %5442 = vmatprep.mubr.f32.mxu1 %v899_v6  ;;  %v901_v48 = vmul.f32 %v6510_v2, %v6875_v30 }
 0x44e   :  { %v874_v5 = vpop.xlane.xlu1 %873  ;;  %v900_v15 = vmul.f32 %v6512_v47, %v6877_v17 }
 0x44f   :  { %6521 = vrcp.f32 %v874_v5 }
 0x450   :  { %v6514_v49 = vpop.eup %6513  ;;  %5443 = vmatmul.mubr.f32.gmra.mrb[8].mxu1 %v900_v15  ;;  %v1547_v15 = vld [vmem:[#allocation2 + $0xe0] sm:$0xff] }
 0x451   :  { %v6516_v55 = vpop.eup %6515  ;;  %5445 = vmatprep.mubr.f32.mxu1 %v901_v48  ;;  %v903_v9 = vmul.f32 %v6514_v49, %v6881_v61  ;;  %v6938_v48 = vld [vmem:[#allocation2 + $0x3e0] sm:$0xff]  ;;  %v1548_v49 = vld [vmem:[#allocation2 + $0xe8] sm:$0xff] }
 0x452   :  { %v902_v56 = vmul.f32 %v6516_v55, %v6883_v32  ;;  %5476 = vmatprep.mubr.msk.f32.mxu0 %vm141_vm0, %v6938_v48  ;;  %v6082_v55 = vpack.c.bf16 %v1548_v49, %v1547_v15  ;;  %v7020_v15 = vld [vmem:[#allocation2 + $0x470] sm:$0xff]  ;;  %v7026_v49 = vld [vmem:[#allocation2 + $0x478] sm:$0xff] }
 0x454   :  { %v6518_v26 = vpop.eup %6517  ;;  %5446 = vmatmul.mubr.f32.gmra.mrb[10].mxu1 %v902_v56  ;;  %6084 = vmatprep.subr.msk.bf16.mxu1 %vm6633_vm1, %v6082_v55 }
 0x455   :  { %v6520_v60 = vpop.eup %6519  ;;  %5448 = vmatprep.mubr.f32.mxu1 %v903_v9  ;;  %v905_v34 = vmul.f32 %v6518_v26, %v6887_v20  ;;  %v1066_v20 = vsub.s32 4, %v6679_v27 }
 0x456   :  { %v904_v7 = vmul.f32 %v6520_v60, %v6889_v54 }
 0x457   :  { %v1067_v54 = vrot.slane %v6682_v29, %v1066_v20  ;;  %v1236_v20 = vsub.s32 5, %v6679_v27 }
 0x458   :  { %5449 = vmatmul.mubr.f32.gmra.mrb[8].mxu1 %v904_v7 }
 0x459   :  { %v6522_v30 = vpop.eup %6521  ;;  %5451 = vmatprep.mubr.f32.mxu1 %v905_v34 }
 0x45a   :  { %v906_v17 = vmul.f32 %v6522_v30, %v6893_v33 }
 0x45c   :  { %5452 = vmatmul.mubr.f32.gmra.mrb[10].mxu1 %v906_v17 }
 0x52b   :  { %v5450_v8 = vpop.f32.mrb[8].mxu1 }
 0x52c   :  { %v1033_v13 = vpop.f32.mrb[9].mxu1 }
 0x52d   :  { %5462 = vmatprep.mubr.msk.f32.mxu1 %vm141_vm0, %v1033_v13 }
 0x52e   :  { %5463 = vmatmul.mubr.msk.f32.vlgmr.msra.gmra.mrb[12].mxu1 %vm141_vm0, %v5450_v8 }
 0x52f   :  { %v5453_v61 = vpop.f32.mrb[10].mxu1  ;;  %6087 = vmatpush3.bf16.xpose.msk.msra.mxu1 %vm6633_vm1, %v6082_v55  ;;  %v7028_v55 = vld [vmem:[#allocation2 + $0x480] sm:$0xff] }
 0x530   :  { %v1043_v32 = vpop.f32.mrb[11].mxu1 }
 0x531   :  { %5465 = vmatprep.mubr.msk.f32.mxu1 %vm141_vm0, %v1043_v32 }
 0x532   :  { %5466 = vmatmul.mubr.msk.f32.gmra.mrb[14].mxu1 %vm141_vm0, %v5453_v61 }
 0x601   :  { %v5464_v14 = vpop.f32.mrb[12].mxu1 }
 0x602   :  { %v1164_v16 = vadd.f32 %v5464_v14, %v1067_v54  ;;  %v1158_v33 = vpop.f32.mrb[13].mxu1  ;;  %v1237_v14 = vrot.slane %v6682_v29, %v1236_v20 }
 0x603   :  { %v1159_v23 = vadd.f32 %v1158_v33, %v1067_v54 }
 0x604   :  { %v1178_v24 = vadd.f32 %v1164_v16, %v6689_v36 }
 0x605   :  { %v5467_v25 = vpop.f32.mrb[14].mxu1  ;;  %v1177_v31 = vadd.f32 %v1159_v23, %v6687_v35 }
 0x606   :  { %v1174_v37 = vadd.f32 %v5467_v25, %v1067_v54  ;;  %v1168_v38 = vpop.f32.mrb[15].mxu1  ;;  %v1184_v40 = vsel %vm141_vm0, %v1178_v24, 0.0 }
 0x607   :  { %v1169_v19 = vadd.f32 %v1168_v38, %v1067_v54  ;;  %1185 = vadd.xlane.f32.xlu1 %v1184_v40  ;;  %v1181_v45 = vsel %vm141_vm0, %v1177_v31, 0.0  ;;  %v1244_v54 = vsub.s32 6, %v6679_v27 }
 0x608   :  { %1182 = vadd.xlane.f32.xlu0 %v1181_v45  ;;  %v1180_v46 = vadd.f32 %v1174_v37, %v6695_v39 }
 0x609   :  { %v1179_v10 = vadd.f32 %v1169_v19, %v6701_v41 }
 0x60a   :  { %v1190_v50 = vsel %vm141_vm0, %v1180_v46, 0.0 }
 0x60b   :  { %1191 = vadd.xlane.f32.xlu1 %v1190_v50  ;;  %v1187_v22 = vsel %vm141_vm0, %v1179_v10, 0.0 }
 0x60c   :  { %1188 = vadd.xlane.f32.xlu0 %v1187_v22 }
 0x694   :  { %v1186_v53 = vpop.xlane.xlu1 %1185 }
 0x695   :  { %v1195_v57 = vmul.f32 0.03125, %v1186_v53  ;;  %v1183_v59 = vpop.xlane.xlu0 %1182 }
 0x696   :  { %v1194_v51 = vmul.f32 0.03125, %v1183_v59 }
 0x697   :  { %v1199_v62 = vsub.f32 %v1178_v24, %v1195_v57  ;;  %v1245_v24 = vrot.slane %v6682_v29, %v1244_v54 }
 0x698   :  { %v1198_v44 = vsub.f32 %v1177_v31, %v1194_v51  ;;  %v1192_v63 = vpop.xlane.xlu1 %1191 }
 0x699   :  { %v1197_v1 = vmul.f32 0.03125, %v1192_v63  ;;  %v1189_v3 = vpop.xlane.xlu0 %1188  ;;  %v1203_v4 = vmul.f32 %v1199_v62, %v1199_v62 }
 0x69a   :  { %v1196_v11 = vmul.f32 0.03125, %v1189_v3  ;;  %v1202_v52 = vmul.f32 %v1198_v44, %v1198_v44  ;;  %v6956_v3 = vld [vmem:[#allocation2 + $0x3f0] sm:$0xff] }
 0x69b   :  { %v1201_v12 = vsub.f32 %v1180_v46, %v1197_v1  ;;  %v1209_v58 = vsel %vm141_vm0, %v1203_v4, 0.0  ;;  %v6954_v1 = vld [vmem:[#allocation2 + $0x3e8] sm:$0xff]  ;;  %v6978_v4 = vld [vmem:[#allocation2 + $0x418] sm:$0xff] }
 0x69c   :  { %v1200_v18 = vsub.f32 %v1179_v10, %v1196_v11  ;;  %1210 = vadd.xlane.f32.xlu1 %v1209_v58  ;;  %v1206_v6 = vsel %vm141_vm0, %v1202_v52, 0.0  ;;  %v6980_v11 = vld [vmem:[#allocation2 + $0x420] sm:$0xff]  ;;  %v6986_v52 = vld [vmem:[#allocation2 + $0x428] sm:$0xff]  ;;  %v6994_v58 = vld [vmem:[#allocation2 + $0x438] sm:$0xff] }
 0x69d   :  { %1207 = vadd.xlane.f32.xlu0 %v1206_v6  ;;  %v1205_v21 = vmul.f32 %v1201_v12, %v1201_v12  ;;  %v7002_v6 = vld [vmem:[#allocation2 + $0x448] sm:$0xff] }
 0x69e   :  { %v1204_v2 = vmul.f32 %v1200_v18, %v1200_v18 }
 0x69f   :  { %v1215_v47 = vsel %vm141_vm0, %v1205_v21, 0.0  ;;  %v7004_v21 = vld [vmem:[#allocation2 + $0x450] sm:$0xff] }
 0x6a0   :  { %1216 = vadd.xlane.f32.xlu1 %v1215_v47  ;;  %v1212_v5 = vsel %vm141_vm0, %v1204_v2, 0.0  ;;  %v7010_v2 = vld [vmem:[#allocation2 + $0x458] sm:$0xff]  ;;  %v7012_v47 = vld [vmem:[#allocation2 + $0x460] sm:$0xff] }
 0x6a1   :  { %1213 = vadd.xlane.f32.xlu0 %v1212_v5  ;;  %v7018_v5 = vld [vmem:[#allocation2 + $0x468] sm:$0xff] }
 0x729   :  { %v1211_v9 = vpop.xlane.xlu1 %1210 }
 0x72a   :  { %v1219_v56 = vmul.f32 0.03125, %v1211_v9  ;;  %v1208_v26 = vpop.xlane.xlu0 %1207  ;;  %v7034_v9 = vld [vmem:[#allocation2 + $0x488] sm:$0xff] }
 0x72b   :  { %v1218_v60 = vmul.f32 0.03125, %v1208_v26  ;;  %v7042_v26 = vld [vmem:[#allocation2 + $0x498] sm:$0xff] }
 0x72c   :  { %v1223_v34 = vadd.f32 1e-05, %v1219_v56  ;;  %v7036_v56 = vld [vmem:[#allocation2 + $0x490] sm:$0xff] }
 0x72d   :  { %v1222_v7 = vadd.f32 1e-05, %v1218_v60  ;;  %v1217_v30 = vpop.xlane.xlu1 %1216  ;;  %v7044_v60 = vld [vmem:[#allocation2 + $0x4a0] sm:$0xff] }
 0x72e   :  { %6523 = vrsqrt.f32 %v1223_v34  ;;  %v1221_v17 = vmul.f32 0.03125, %v1217_v30  ;;  %v1214_v8 = vpop.xlane.xlu0 %1213  ;;  %v7050_v34 = vld [vmem:[#allocation2 + $0x4a8] sm:$0xff]  ;;  %v7058_v30 = vld [vmem:[#allocation2 + $0x4b8] sm:$0xff] }
 0x72f   :  { %6525 = vrsqrt.f32 %v1222_v7  ;;  %v1220_v13 = vmul.f32 0.03125, %v1214_v8  ;;  %v7052_v7 = vld [vmem:[#allocation2 + $0x4b0] sm:$0xff]  ;;  %v1550_v8 = vld [vmem:[#allocation2 + $0xf8] sm:$0xff] }
 0x730   :  { %v1225_v61 = vadd.f32 1e-05, %v1221_v17  ;;  %v1549_v17 = vld [vmem:[#allocation2 + $0xf0] sm:$0xff] }
 0x731   :  { %v1224_v32 = vadd.f32 1e-05, %v1220_v13  ;;  %v6088_v13 = vpack.c.bf16 %v1550_v8, %v1549_v17  ;;  %v1886_v17 = vld [vmem:[#allocation2 + $0x120] sm:$0xff]  ;;  %v1887_v8 = vld [vmem:[#allocation2 + $0x128] sm:$0xff] }
 0x732   :  { %6527 = vrsqrt.f32 %v1225_v61  ;;  %v1543_v61 = vld [vmem:[#allocation2 + $0xc0] sm:$0xff] }
 0x733   :  { %6529 = vrsqrt.f32 %v1224_v32  ;;  %6090 = vmatprep.subr.msk.bf16.mxu1 %vm6633_vm1, %v6088_v13  ;;  %v1544_v32 = vld [vmem:[#allocation2 + $0xc8] sm:$0xff] }
 0x734   :  { %6093 = vmatpush3.bf16.xpose.msk.msra.mxu1 %vm6633_vm1, %v6088_v13  ;;  %v6094_v20 = vpack.c.bf16 %v1544_v32, %v1543_v61  ;;  %v6118_v61 = vpack.c.bf16 %v1887_v8, %v1886_v17 }
 0x736   :  { %6096 = vmatprep.subr.msk.bf16.mxu1 %vm6633_vm1, %v6094_v20 }
 0x738   :  { %v6524_v16 = vpop.eup %6523 }
 0x739   :  { %v6526_v33 = vpop.eup %6525  ;;  %v1231_v23 = vmul.f32 %v6524_v16, %v1199_v62 }
 0x73a   :  { %v1230_v25 = vmul.f32 %v6526_v33, %v1198_v44 }
 0x73b   :  { %v1239_v31 = vmul.f32 %v1237_v14, %v1231_v23  ;;  %v1545_v23 = vld [vmem:[#allocation2 + $0xd0] sm:$0xff] }
 0x73c   :  { %v6528_v37 = vpop.eup %6527  ;;  %v1238_v38 = vmul.f32 %v1237_v14, %v1230_v25 }
 0x73d   :  { %v6530_v40 = vpop.eup %6529  ;;  %v1233_v19 = vmul.f32 %v6528_v37, %v1201_v12  ;;  %v1247_v45 = vadd.f32 %v1245_v24, %v1239_v31  ;;  %v6988_v12 = vld [vmem:[#allocation2 + $0x430] sm:$0xff] }
 0x73e   :  { %v1232_v46 = vmul.f32 %v6530_v40, %v1200_v18  ;;  %v1246_v10 = vadd.f32 %v1245_v24, %v1238_v38  ;;  %v6996_v18 = vld [vmem:[#allocation2 + $0x440] sm:$0xff] }
 0x73f   :  { %v1251_v50 = vadd.f32 %v1247_v45, %v6689_v36  ;;  %v1241_v22 = vmul.f32 %v1237_v14, %v1233_v19  ;;  %v6964_v36 = vld [vmem:[#allocation2 + $0x400] sm:$0xff]  ;;  %v1770_v45 = vld [vmem:[#allocation2 + $0x108] sm:$0xff] }
 0x740   :  { %v1250_v53 = vadd.f32 %v1246_v10, %v6687_v35  ;;  %v1240_v57 = vmul.f32 %v1237_v14, %v1232_v46  ;;  %v6962_v35 = vld [vmem:[#allocation2 + $0x3f8] sm:$0xff]  ;;  %v1769_v19 = vld [vmem:[#allocation2 + $0x100] sm:$0xff] }
 0x741   :  { %v1249_v59 = vadd.f32 %v1245_v24, %v1241_v22  ;;  %v6106_v10 = vpack.c.bf16 %v1770_v45, %v1769_v19 }
 0x742   :  { %v6074_v51 = vpack.c.bf16 %v1251_v50, %v1250_v53  ;;  %v1248_v62 = vadd.f32 %v1245_v24, %v1240_v57  ;;  %v1546_v24 = vld [vmem:[#allocation2 + $0xd8] sm:$0xff]  ;;  %v1771_v57 = vld [vmem:[#allocation2 + $0x110] sm:$0xff] }
 0x743   :  { %v1253_v29 = vadd.f32 %v1249_v59, %v6695_v39  ;;  %v6970_v39 = vld [vmem:[#allocation2 + $0x408] sm:$0xff]  ;;  %v6100_v37 = vpack.c.bf16 %v1546_v24, %v1545_v23  ;;  %v1772_v59 = vld [vmem:[#allocation2 + $0x118] sm:$0xff] }
 0x744   :  { %6075 = vmatprep.subr.bf16.mxu0 %v6074_v51  ;;  %v1252_v44 = vadd.f32 %v1248_v62, %v6701_v41  ;;  %v6972_v41 = vld [vmem:[#allocation2 + $0x410] sm:$0xff]  ;;  %v6112_v62 = vpack.c.bf16 %v1772_v59, %v1771_v57  ;;  %v2121_v59 = vld [vmem:[#allocation2 + $0x168] sm:$0xff] }
 0x745   :  { %6077 = vmatpush3.bf16.msra.mxu0 %v6074_v51 }
 0x746   :  { %v6078_v63 = vpack.c.bf16 %v1253_v29, %v1252_v44 }
 0x748   :  { %6079 = vmatprep.subr.bf16.mxu0 %v6078_v63 }
 0x749   :  { %6081 = vmatpush3.bf16.msra.mxu0 %v6078_v63 }
 0x74c   :  { %5477 = vmatmul.mubr.msk.f32.vlgmr.msra.gmra.mrb[12].mxu0 %vm141_vm0, %v6954_v1 }
 0x74d   :  { %5479 = vmatprep.mubr.msk.f32.mxu0 %vm141_vm0, %v6956_v3 }
 0x750   :  { %5480 = vmatmul.mubr.msk.f32.gmra.mrb[14].mxu0 %vm141_vm0, %v6962_v35 }
 0x751   :  { %5482 = vmatprep.mubr.msk.f32.mxu0 %vm141_vm0, %v6964_v36 }
 0x754   :  { %5483 = vmatmul.mubr.msk.f32.gmra.mrb[16].mxu0 %vm141_vm0, %v6970_v39 }
 0x755   :  { %5485 = vmatprep.mubr.msk.f32.mxu0 %vm141_vm0, %v6972_v41 }
 0x758   :  { %5486 = vmatmul.mubr.msk.f32.gmra.mrb[18].mxu0 %vm141_vm0, %v6978_v4 }
 0x759   :  { %5488 = vmatprep.mubr.msk.f32.mxu0 %vm141_vm0, %v6980_v11 }
 0x75c   :  { %5489 = vmatmul.mubr.msk.f32.gmra.mrb[20].mxu0 %vm141_vm0, %v6986_v52 }
 0x75d   :  { %5491 = vmatprep.mubr.msk.f32.mxu0 %vm141_vm0, %v6988_v12 }
 0x760   :  { %5492 = vmatmul.mubr.msk.f32.gmra.mrb[22].mxu0 %vm141_vm0, %v6994_v58 }
 0x761   :  { %5494 = vmatprep.mubr.msk.f32.mxu0 %vm141_vm0, %v6996_v18 }
 0x764   :  { %5495 = vmatmul.mubr.msk.f32.gmra.mrb[24].mxu0 %vm141_vm0, %v7002_v6 }
 0x765   :  { %5497 = vmatprep.mubr.msk.f32.mxu0 %vm141_vm0, %v7004_v21 }
 0x768   :  { %5498 = vmatmul.mubr.msk.f32.gmra.mrb[26].mxu0 %vm141_vm0, %v7010_v2 }
 0x769   :  { %5500 = vmatprep.mubr.msk.f32.mxu0 %vm141_vm0, %v7012_v47 }
 0x76c   :  { %5501 = vmatmul.mubr.msk.f32.gmra.mrb[28].mxu0 %vm141_vm0, %v7018_v5 }
 0x76d   :  { %5503 = vmatprep.mubr.msk.f32.mxu0 %vm141_vm0, %v7020_v15 }
 0x770   :  { %5504 = vmatmul.mubr.msk.f32.gmra.mrb[30].mxu0 %vm141_vm0, %v7026_v49 }
 0x771   :  { %5506 = vmatprep.mubr.msk.f32.mxu0 %vm141_vm0, %v7028_v55 }
 0x774   :  { %5507 = vmatmul.mubr.msk.f32.gmra.mrb[32].mxu0 %vm141_vm0, %v7034_v9 }
 0x775   :  { %5509 = vmatprep.mubr.msk.f32.mxu0 %vm141_vm0, %v7036_v56 }
 0x778   :  { %5510 = vmatmul.mubr.msk.f32.gmra.mrb[34].mxu0 %vm141_vm0, %v7042_v26 }
 0x779   :  { %5512 = vmatprep.mubr.msk.f32.mxu0 %vm141_vm0, %v7044_v60 }
 0x77c   :  { %5513 = vmatmul.mubr.msk.f32.gmra.mrb[36].mxu0 %vm141_vm0, %v7050_v34 }
 0x77d   :  { %5515 = vmatprep.mubr.msk.f32.mxu0 %vm141_vm0, %v7052_v7 }
 0x780   :  { %5516 = vmatmul.mubr.msk.f32.gmra.mrb[38].mxu0 %vm141_vm0, %v7058_v30 }
 0x781   :  { %5624 = vmatprep.mubr.msk.f32.mxu0 %vm141_vm0, %v6938_v48 }
 0x81f   :  { %v5478_v54 = vpop.f32.mrb[12].mxu0 }
 0x820   :  { %v1404_v14 = vpop.f32.mrb[13].mxu0 }
 0x823   :  { %v5481_v16 = vpop.f32.mrb[14].mxu0 }
 0x824   :  { %v1414_v33 = vpop.f32.mrb[15].mxu0 }
 0x827   :  { %v5484_v25 = vpop.f32.mrb[16].mxu0 }
 0x828   :  { %v1424_v31 = vpop.f32.mrb[17].mxu0 }
 0x829   :  { %5526 = vmatprep.mubr.msk.f32.mxu1 %vm141_vm0, %v1424_v31 }
 0x82a   :  { %5527 = vmatmul.mubr.msk.f32.vlgmr.msra.gmra.mrb[16].mxu1 %vm141_vm0, %v5484_v25 }
 0x82b   :  { %6099 = vmatpush3.bf16.xpose.msk.msra.mxu1 %vm6633_vm1, %v6094_v20  ;;  %v5487_v38 = vpop.f32.mrb[18].mxu0 }
 0x82c   :  { %v1434_v40 = vpop.f32.mrb[19].mxu0  ;;  %6102 = vmatprep.subr.msk.bf16.mxu1 %vm6633_vm1, %v6100_v37 }
 0x82d   :  { %5529 = vmatprep.mubr.msk.f32.mxu1 %vm141_vm0, %v1434_v40 }
 0x82e   :  { %5530 = vmatmul.mubr.msk.f32.gmra.mrb[18].mxu1 %vm141_vm0, %v5487_v38  ;;  %v2004_v38 = vld [vmem:[#allocation2 + $0x148] sm:$0xff] }
 0x82f   :  { %5540 = vmatprep.mubr.msk.f32.mxu1 %vm141_vm0, %v1404_v14  ;;  %v5490_v46 = vpop.f32.mrb[20].mxu0  ;;  %v1888_v14 = vld [vmem:[#allocation2 + $0x130] sm:$0xff] }
 0x830   :  { %v1444_v50 = vpop.f32.mrb[21].mxu0 }
 0x833   :  { %6105 = vmatpush3.bf16.xpose.msk.msra.mxu1 %vm6633_vm1, %v6100_v37  ;;  %v5493_v22 = vpop.f32.mrb[22].mxu0  ;;  %v2003_v37 = vld [vmem:[#allocation2 + $0x140] sm:$0xff] }
 0x834   :  { %6108 = vmatprep.subr.msk.bf16.mxu1 %vm6633_vm1, %v6106_v10  ;;  %v1454_v53 = vpop.f32.mrb[23].mxu0  ;;  %v6130_v19 = vpack.c.bf16 %v2004_v38, %v2003_v37 }
 0x837   :  { %v5496_v51 = vpop.f32.mrb[24].mxu0 }
 0x838   :  { %v1464_v29 = vpop.f32.mrb[25].mxu0 }
 0x83a   :  { %5541 = vmatmul.mubr.msk.f32.vlgmr.msra.gmra.mrb[16].mxu1 %vm141_vm0, %v5478_v54 }
 0x83b   :  { %5543 = vmatprep.mubr.msk.f32.mxu1 %vm141_vm0, %v1414_v33  ;;  %6111 = vmatpush3.bf16.xpose.msk.msra.mxu1 %vm6633_vm1, %v6106_v10  ;;  %v5499_v44 = vpop.f32.mrb[26].mxu0  ;;  %v1889_v33 = vld [vmem:[#allocation2 + $0x138] sm:$0xff] }
 0x83c   :  { %6114 = vmatprep.subr.msk.bf16.mxu1 %vm6633_vm1, %v6112_v62  ;;  %v1474_v63 = vpop.f32.mrb[27].mxu0  ;;  %v6124_v24 = vpack.c.bf16 %v1889_v33, %v1888_v14 }
 0x83e   :  { %5544 = vmatmul.mubr.msk.f32.gmra.mrb[18].mxu1 %vm141_vm0, %v5481_v16 }
 0x83f   :  { %5554 = vmatprep.mubr.msk.f32.mxu1 %vm141_vm0, %v1444_v50  ;;  %v5502_v13 = vpop.f32.mrb[28].mxu0  ;;  %v2005_v50 = vld [vmem:[#allocation2 + $0x150] sm:$0xff] }
 0x840   :  { %v1484_v32 = vpop.f32.mrb[29].mxu0 }
 0x843   :  { %6117 = vmatpush3.bf16.xpose.msk.msra.mxu1 %vm6633_vm1, %v6112_v62  ;;  %v5505_v20 = vpop.f32.mrb[30].mxu0 }
 0x844   :  { %6120 = vmatprep.subr.msk.bf16.mxu1 %vm6633_vm1, %v6118_v61  ;;  %v1494_v54 = vpop.f32.mrb[31].mxu0 }
 0x847   :  { %v5508_v23 = vpop.f32.mrb[32].mxu0 }
 0x848   :  { %v1504_v25 = vpop.f32.mrb[33].mxu0 }
 0x84a   :  { %5555 = vmatmul.mubr.msk.f32.vlgmr.msra.gmra.mrb[16].mxu1 %vm141_vm0, %v5490_v46 }
 0x84b   :  { %6123 = vmatpush3.bf16.xpose.msk.msra.mxu1 %vm6633_vm1, %v6118_v61  ;;  %5557 = vmatprep.mubr.msk.f32.mxu1 %vm141_vm0, %v1454_v53  ;;  %v5511_v16 = vpop.f32.mrb[34].mxu0  ;;  %v2006_v53 = vld [vmem:[#allocation2 + $0x158] sm:$0xff] }
 0x84c   :  { %6126 = vmatprep.subr.msk.bf16.mxu1 %vm6633_vm1, %v6124_v24  ;;  %v1514_v31 = vpop.f32.mrb[35].mxu0  ;;  %v6136_v57 = vpack.c.bf16 %v2006_v53, %v2005_v50  ;;  %v2240_v61 = vld [vmem:[#allocation2 + $0x198] sm:$0xff]  ;;  %v2576_v50 = vld [vmem:[#allocation2 + $0x1c8] sm:$0xff] }
 0x84e   :  { %5558 = vmatmul.mubr.msk.f32.gmra.mrb[18].mxu1 %vm141_vm0, %v5493_v22  ;;  %v2120_v22 = vld [vmem:[#allocation2 + $0x160] sm:$0xff] }
 0x84f   :  { %5568 = vmatprep.mubr.msk.f32.mxu1 %vm141_vm0, %v1464_v29  ;;  %v5514_v40 = vpop.f32.mrb[36].mxu0  ;;  %v6142_v62 = vpack.c.bf16 %v2121_v59, %v2120_v22  ;;  %v2123_v29 = vld [vmem:[#allocation2 + $0x178] sm:$0xff]  ;;  %v2577_v59 = vld [vmem:[#allocation2 + $0x1d0] sm:$0xff] }
 0x850   :  { %v1524_v45 = vpop.f32.mrb[37].mxu0 }
 0x853   :  { %6129 = vmatpush3.bf16.xpose.msk.msra.mxu1 %vm6633_vm1, %v6124_v24  ;;  %v5517_v46 = vpop.f32.mrb[38].mxu0 }
 0x854   :  { %6132 = vmatprep.subr.msk.bf16.mxu1 %vm6633_vm1, %v6130_v19  ;;  %v1534_v10 = vpop.f32.mrb[39].mxu0 }
 0x85a   :  { %5569 = vmatmul.mubr.msk.f32.vlgmr.msra.gmra.mrb[16].mxu1 %vm141_vm0, %v5496_v51  ;;  %v2122_v51 = vld [vmem:[#allocation2 + $0x170] sm:$0xff] }
 0x85b   :  { %6135 = vmatpush3.bf16.xpose.msk.msra.mxu1 %vm6633_vm1, %v6130_v19  ;;  %5571 = vmatprep.mubr.msk.f32.mxu1 %vm141_vm0, %v1474_v63  ;;  %v6148_v17 = vpack.c.bf16 %v2123_v29, %v2122_v51  ;;  %v2238_v63 = vld [vmem:[#allocation2 + $0x188] sm:$0xff] }
 0x85c   :  { %6138 = vmatprep.subr.msk.bf16.mxu1 %vm6633_vm1, %v6136_v57  ;;  %v2572_v29 = vld [vmem:[#allocation2 + $0x1a8] sm:$0xff] }
 0x85e   :  { %5572 = vmatmul.mubr.msk.f32.gmra.mrb[18].mxu1 %vm141_vm0, %v5499_v44  ;;  %v2237_v44 = vld [vmem:[#allocation2 + $0x180] sm:$0xff] }
 0x85f   :  { %5582 = vmatprep.mubr.msk.f32.mxu1 %vm141_vm0, %v1484_v32  ;;  %v6154_v8 = vpack.c.bf16 %v2238_v63, %v2237_v44 }
 0x863   :  { %6141 = vmatpush3.bf16.xpose.msk.msra.mxu1 %vm6633_vm1, %v6136_v57 }
 0x864   :  { %6144 = vmatprep.subr.msk.bf16.mxu1 %vm6633_vm1, %v6142_v62 }
 0x86a   :  { %5583 = vmatmul.mubr.msk.f32.vlgmr.msra.gmra.mrb[16].mxu1 %vm141_vm0, %v5502_v13  ;;  %v2239_v13 = vld [vmem:[#allocation2 + $0x190] sm:$0xff] }
 0x86b   :  { %6147 = vmatpush3.bf16.xpose.msk.msra.mxu1 %vm6633_vm1, %v6142_v62  ;;  %5585 = vmatprep.mubr.msk.f32.mxu1 %vm141_vm0, %v1494_v54  ;;  %v6160_v32 = vpack.c.bf16 %v2240_v61, %v2239_v13  ;;  %v6531_v54 = vld [vmem:[#allocation2 + $0x4c0] sm:$0xff]  ;;  %v2578_v62 = vld [vmem:[#allocation2 + $0x1d8] sm:$0xff]  ;;  %v2573_v61 = vld [vmem:[#allocation2 + $0x1b0] sm:$0xff] }
 0x86c   :  { %6150 = vmatprep.subr.msk.bf16.mxu1 %vm6633_vm1, %v6148_v17  ;;  %v6180_v51 = vpack.c.bf16 %v2578_v62, %v2577_v59  ;;  %v2915_v59 = vld [vmem:[#allocation2 + $0x208] sm:$0xff] }
 0x86e   :  { %5586 = vmatmul.mubr.msk.f32.gmra.mrb[18].mxu1 %vm141_vm0, %v5505_v20  ;;  %v2356_v20 = vsub.s32 7, %v6679_v27 }
 0x86f   :  { %5596 = vmatprep.mubr.msk.f32.mxu1 %vm141_vm0, %v1504_v25 }
 0x870   :  { %v2357_v14 = vrot.slane %v6531_v54, %v2356_v20 }
 0x873   :  { %6153 = vmatpush3.bf16.xpose.msk.msra.mxu1 %vm6633_vm1, %v6148_v17 }
 0x874   :  { %6156 = vmatprep.subr.msk.bf16.mxu1 %vm6633_vm1, %v6154_v8 }
 0x87a   :  { %5597 = vmatmul.mubr.msk.f32.vlgmr.msra.gmra.mrb[16].mxu1 %vm141_vm0, %v5508_v23 }
 0x87b   :  { %6159 = vmatpush3.bf16.xpose.msk.msra.mxu1 %vm6633_vm1, %v6154_v8  ;;  %5599 = vmatprep.mubr.msk.f32.mxu1 %vm141_vm0, %v1514_v31 }
 0x87c   :  { %6162 = vmatprep.subr.msk.bf16.mxu1 %vm6633_vm1, %v6160_v32 }
 0x87e   :  { %5600 = vmatmul.mubr.msk.f32.gmra.mrb[18].mxu1 %vm141_vm0, %v5511_v16 }
 0x87f   :  { %5610 = vmatprep.mubr.msk.f32.mxu1 %vm141_vm0, %v1524_v45 }
 0x883   :  { %6165 = vmatpush3.bf16.xpose.msk.msra.mxu1 %vm6633_vm1, %v6160_v32  ;;  %v2574_v32 = vld [vmem:[#allocation2 + $0x1b8] sm:$0xff] }
 0x88a   :  { %5611 = vmatmul.mubr.msk.f32.vlgmr.msra.gmra.mrb[16].mxu1 %vm141_vm0, %v5514_v40 }
 0x88b   :  { %5613 = vmatprep.mubr.msk.f32.mxu1 %vm141_vm0, %v1534_v10 }
 0x88e   :  { %5614 = vmatmul.mubr.msk.f32.gmra.mrb[18].mxu1 %vm141_vm0, %v5517_v46  ;;  %v2575_v46 = vld [vmem:[#allocation2 + $0x1c0] sm:$0xff] }
 0x88f   :  { %5787 = vmatprep.mubr.msk.f32.mxu1 %vm141_vm0, %v6988_v12  ;;  %v6174_v22 = vpack.c.bf16 %v2576_v50, %v2575_v46 }
 0x95d   :  { %v5612_v33 = vpop.f32.mrb[16].mxu1 }
 0x95e   :  { %v2359_v23 = vadd.f32 %v5612_v33, %v2357_v14  ;;  %v2331_v24 = vpop.f32.mrb[17].mxu1 }
 0x95f   :  { %v2358_v25 = vadd.f32 %v2357_v14, %v2331_v24  ;;  %v2797_v24 = vld [vmem:[#allocation2 + $0x1e0] sm:$0xff] }
 0x960   :  { %v2363_v16 = vmax.f32 %v2359_v23, 0.0 }
 0x961   :  { %v2362_v31 = vmax.f32 %v2358_v25, 0.0  ;;  %v5615_v37 = vpop.f32.mrb[18].mxu1  ;;  %v2798_v25 = vld [vmem:[#allocation2 + $0x1e8] sm:$0xff] }
 0x962   :  { %v2361_v38 = vadd.f32 %v5615_v37, %v2357_v14  ;;  %v2341_v40 = vpop.f32.mrb[19].mxu1 }
 0x963   :  { %v6166_v19 = vpack.c.bf16 %v2363_v16, %v2362_v31  ;;  %v2360_v45 = vadd.f32 %v2357_v14, %v2341_v40  ;;  %v6192_v14 = vpack.c.bf16 %v2574_v32, %v2573_v61  ;;  %v6198_v31 = vpack.c.bf16 %v2798_v25, %v2797_v24 }
 0x964   :  { %v2365_v10 = vmax.f32 %v2361_v38, 0.0 }
 0x965   :  { %v2364_v53 = vmax.f32 %v2360_v45, 0.0  ;;  %6167 = vmatprep.subr.bf16.mxu0 %v6166_v19  ;;  %v2800_v45 = vld [vmem:[#allocation2 + $0x1f8] sm:$0xff] }
 0x966   :  { %6169 = vmatpush3.bf16.msra.mxu0 %v6166_v19  ;;  %v2799_v19 = vld [vmem:[#allocation2 + $0x1f0] sm:$0xff] }
 0x967   :  { %v6170_v57 = vpack.c.bf16 %v2365_v10, %v2364_v53  ;;  %v6204_v46 = vpack.c.bf16 %v2800_v45, %v2799_v19  ;;  %v3149_v19 = vld [vmem:[#allocation2 + $0x248] sm:$0xff] }
 0x969   :  { %6171 = vmatprep.subr.bf16.mxu0 %v6170_v57 }
 0x96a   :  { %6173 = vmatpush3.bf16.msra.mxu0 %v6170_v57 }
 0x96b   :  { %6176 = vmatprep.subr.msk.bf16.mxu0 %vm6633_vm1, %v6174_v22 }
 0x96d   :  { %5625 = vmatmul.mubr.msk.f32.vlgmr.msra.gmra.mrb[40].mxu0 %vm141_vm0, %v6954_v1 }
 0x96e   :  { %5627 = vmatprep.mubr.msk.f32.mxu0 %vm141_vm0, %v6956_v3 }
 0x971   :  { %5628 = vmatmul.mubr.msk.f32.gmra.mrb[42].mxu0 %vm141_vm0, %v6962_v35 }
 0x972   :  { %5630 = vmatprep.mubr.msk.f32.mxu0 %vm141_vm0, %v6964_v36 }
 0x973   :  { %6179 = vmatpush3.bf16.xpose.msk.msra.mxu0 %vm6633_vm1, %v6174_v22  ;;  %v2914_v22 = vld [vmem:[#allocation2 + $0x200] sm:$0xff] }
 0x974   :  { %6182 = vmatprep.subr.msk.bf16.mxu0 %vm6633_vm1, %v6180_v51 }
 0x975   :  { %5631 = vmatmul.mubr.msk.f32.gmra.mrb[44].mxu0 %vm141_vm0, %v6970_v39 }
 0x976   :  { %5633 = vmatprep.mubr.msk.f32.mxu0 %vm141_vm0, %v6972_v41 }
 0x979   :  { %5634 = vmatmul.mubr.msk.f32.gmra.mrb[46].mxu0 %vm141_vm0, %v6978_v4 }
 0x97a   :  { %5636 = vmatprep.mubr.msk.f32.mxu0 %vm141_vm0, %v6980_v11 }
 0x97b   :  { %6185 = vmatpush3.bf16.xpose.msk.msra.mxu0 %vm6633_vm1, %v6180_v51  ;;  %v6210_v51 = vpack.c.bf16 %v2915_v59, %v2914_v22  ;;  %v3267_v59 = vld [vmem:[#allocation2 + $0x270] sm:$0xff] }
 0x97d   :  { %5637 = vmatmul.mubr.msk.f32.gmra.mrb[48].mxu0 %vm141_vm0, %v6986_v52 }
 0x97e   :  { %5639 = vmatprep.mubr.msk.f32.mxu0 %vm141_vm0, %v6988_v12  ;;  %v2571_v12 = vld [vmem:[#allocation2 + $0x1a0] sm:$0xff] }
 0x97f   :  { %v6186_v17 = vpack.c.bf16 %v2572_v29, %v2571_v12 }
 0x981   :  { %5640 = vmatmul.mubr.msk.f32.gmra.mrb[50].mxu0 %vm141_vm0, %v6994_v58  ;;  %6188 = vmatprep.subr.msk.bf16.mxu0 %vm6633_vm1, %v6186_v17 }
 0x982   :  { %5642 = vmatprep.mubr.msk.f32.mxu0 %vm141_vm0, %v6996_v18 }
 0x985   :  { %5643 = vmatmul.mubr.msk.f32.gmra.mrb[52].mxu0 %vm141_vm0, %v7002_v6 }
 0x986   :  { %5645 = vmatprep.mubr.msk.f32.mxu0 %vm141_vm0, %v7004_v21 }
 0x989   :  { %5646 = vmatmul.mubr.msk.f32.gmra.mrb[54].mxu0 %vm141_vm0, %v7010_v2 }
 0x98a   :  { %5648 = vmatprep.mubr.msk.f32.mxu0 %vm141_vm0, %v7012_v47 }
 0x98d   :  { %5649 = vmatmul.mubr.msk.f32.gmra.mrb[56].mxu0 %vm141_vm0, %v7018_v5 }
 0x98e   :  { %5651 = vmatprep.mubr.msk.f32.mxu0 %vm141_vm0, %v7020_v15 }
 0x991   :  { %5652 = vmatmul.mubr.msk.f32.gmra.mrb[58].mxu0 %vm141_vm0, %v7026_v49 }
 0x992   :  { %5654 = vmatprep.mubr.msk.f32.mxu0 %vm141_vm0, %v7028_v55 }
 0x995   :  { %5655 = vmatmul.mubr.msk.f32.gmra.mrb[60].mxu0 %vm141_vm0, %v7034_v9 }
 0x996   :  { %5657 = vmatprep.mubr.msk.f32.mxu0 %vm141_vm0, %v7036_v56 }
 0x999   :  { %5658 = vmatmul.mubr.msk.f32.gmra.mrb[62].mxu0 %vm141_vm0, %v7042_v26 }
 0x99a   :  { %5660 = vmatprep.mubr.msk.f32.mxu0 %vm141_vm0, %v7044_v60 }
 0x99d   :  { %5661 = vmatmul.mubr.msk.f32.gmra.mrb[64].mxu0 %vm141_vm0, %v7050_v34 }
 0x99e   :  { %5663 = vmatprep.mubr.msk.f32.mxu0 %vm141_vm0, %v7052_v7 }
 0x9a1   :  { %5664 = vmatmul.mubr.msk.f32.gmra.mrb[66].mxu0 %vm141_vm0, %v7058_v30 }
 0xa40   :  { %v5626_v44 = vpop.f32.mrb[40].mxu0 }
 0xa41   :  { %v2432_v63 = vpop.f32.mrb[41].mxu0 }
 0xa44   :  { %v5629_v8 = vpop.f32.mrb[42].mxu0 }
 0xa45   :  { %v2442_v13 = vpop.f32.mrb[43].mxu0 }
 0xa48   :  { %v5632_v20 = vpop.f32.mrb[44].mxu0 }
 0xa49   :  { %v2452_v54 = vpop.f32.mrb[45].mxu0 }
 0xa4a   :  { %5674 = vmatprep.mubr.msk.f32.mxu0 %vm141_vm0, %v2452_v54  ;;  %v3031_v54 = vld [vmem:[#allocation2 + $0x220] sm:$0xff] }
 0xa4b   :  { %5675 = vmatmul.mubr.msk.f32.vlgmr.msra.gmra.mrb[68].mxu0 %vm141_vm0, %v5632_v20 }
 0xa4c   :  { %6191 = vmatpush3.bf16.xpose.msk.msra.mxu0 %vm6633_vm1, %v6186_v17  ;;  %v5635_v33 = vpop.f32.mrb[46].mxu0 }
 0xa4d   :  { %6194 = vmatprep.subr.msk.bf16.mxu0 %vm6633_vm1, %v6192_v14  ;;  %v2462_v23 = vpop.f32.mrb[47].mxu0 }
 0xa4e   :  { %5677 = vmatprep.mubr.msk.f32.mxu0 %vm141_vm0, %v2462_v23 }
 0xa4f   :  { %5678 = vmatmul.mubr.msk.f32.gmra.mrb[70].mxu0 %vm141_vm0, %v5635_v33 }
 0xa50   :  { %5688 = vmatprep.mubr.msk.f32.mxu0 %vm141_vm0, %v2432_v63  ;;  %v5638_v16 = vpop.f32.mrb[48].mxu0  ;;  %v2917_v63 = vld [vmem:[#allocation2 + $0x218] sm:$0xff] }
 0xa51   :  { %v2472_v37 = vpop.f32.mrb[49].mxu0 }
 0xa54   :  { %6197 = vmatpush3.bf16.xpose.msk.msra.mxu0 %vm6633_vm1, %v6192_v14  ;;  %v5641_v38 = vpop.f32.mrb[50].mxu0  ;;  %v3032_v14 = vld [vmem:[#allocation2 + $0x228] sm:$0xff] }
 0xa55   :  { %6200 = vmatprep.subr.msk.bf16.mxu0 %vm6633_vm1, %v6198_v31  ;;  %v2482_v40 = vpop.f32.mrb[51].mxu0  ;;  %v6222_v23 = vpack.c.bf16 %v3032_v14, %v3031_v54 }
 0xa58   :  { %v5644_v10 = vpop.f32.mrb[52].mxu0 }
 0xa59   :  { %v2492_v50 = vpop.f32.mrb[53].mxu0 }
 0xa5b   :  { %5689 = vmatmul.mubr.msk.f32.vlgmr.msra.gmra.mrb[68].mxu0 %vm141_vm0, %v5626_v44  ;;  %v2916_v44 = vld [vmem:[#allocation2 + $0x210] sm:$0xff] }
 0xa5c   :  { %6203 = vmatpush3.bf16.xpose.msk.msra.mxu0 %vm6633_vm1, %v6198_v31  ;;  %5691 = vmatprep.mubr.msk.f32.mxu0 %vm141_vm0, %v2442_v13  ;;  %v5647_v53 = vpop.f32.mrb[54].mxu0  ;;  %v6216_v61 = vpack.c.bf16 %v2917_v63, %v2916_v44  ;;  %v3033_v31 = vld [vmem:[#allocation2 + $0x230] sm:$0xff] }
 0xa5d   :  { %6206 = vmatprep.subr.msk.bf16.mxu0 %vm6633_vm1, %v6204_v46  ;;  %v2502_v57 = vpop.f32.mrb[55].mxu0 }
 0xa5f   :  { %5692 = vmatmul.mubr.msk.f32.gmra.mrb[70].mxu0 %vm141_vm0, %v5629_v8 }
 0xa60   :  { %5702 = vmatprep.mubr.msk.f32.mxu0 %vm141_vm0, %v2472_v37  ;;  %v5650_v62 = vpop.f32.mrb[56].mxu0  ;;  %v3034_v37 = vld [vmem:[#allocation2 + $0x238] sm:$0xff] }
 0xa61   :  { %v2512_v12 = vpop.f32.mrb[57].mxu0 }
 0xa64   :  { %6209 = vmatpush3.bf16.xpose.msk.msra.mxu0 %vm6633_vm1, %v6204_v46  ;;  %v5653_v29 = vpop.f32.mrb[58].mxu0  ;;  %v3151_v46 = vld [vmem:[#allocation2 + $0x258] sm:$0xff] }
 0xa65   :  { %6212 = vmatprep.subr.msk.bf16.mxu0 %vm6633_vm1, %v6210_v51  ;;  %v2522_v17 = vpop.f32.mrb[59].mxu0 }
 0xa68   :  { %v5656_v13 = vpop.f32.mrb[60].mxu0 }
 0xa69   :  { %v2532_v32 = vpop.f32.mrb[61].mxu0 }
 0xa6b   :  { %5703 = vmatmul.mubr.msk.f32.vlgmr.msra.gmra.mrb[68].mxu0 %vm141_vm0, %v5638_v16 }
 0xa6c   :  { %6215 = vmatpush3.bf16.xpose.msk.msra.mxu0 %vm6633_vm1, %v6210_v51  ;;  %5705 = vmatprep.mubr.msk.f32.mxu0 %vm141_vm0, %v2482_v40  ;;  %v5659_v8 = vpop.f32.mrb[62].mxu0  ;;  %v6228_v40 = vpack.c.bf16 %v3034_v37, %v3033_v31  ;;  %v3605_v31 = vld [vmem:[#allocation2 + $0x2b0] sm:$0xff]  ;;  %v3606_v37 = vld [vmem:[#allocation2 + $0x2b8] sm:$0xff] }
 0xa6d   :  { %6218 = vmatprep.subr.msk.bf16.mxu0 %vm6633_vm1, %v6216_v61  ;;  %v2542_v20 = vpop.f32.mrb[63].mxu0 }
 0xa6f   :  { %5706 = vmatmul.mubr.msk.f32.gmra.mrb[70].mxu0 %vm141_vm0, %v5641_v38  ;;  %v3148_v38 = vld [vmem:[#allocation2 + $0x240] sm:$0xff] }
 0xa70   :  { %5716 = vmatprep.mubr.msk.f32.mxu0 %vm141_vm0, %v2492_v50  ;;  %v5662_v33 = vpop.f32.mrb[64].mxu0  ;;  %v6234_v45 = vpack.c.bf16 %v3149_v19, %v3148_v38 }
 0xa71   :  { %v2552_v24 = vpop.f32.mrb[65].mxu0 }
 0xa74   :  { %6221 = vmatpush3.bf16.xpose.msk.msra.mxu0 %vm6633_vm1, %v6216_v61  ;;  %v5665_v25 = vpop.f32.mrb[66].mxu0 }
 0xa75   :  { %6224 = vmatprep.subr.msk.bf16.mxu0 %vm6633_vm1, %v6222_v23  ;;  %v2562_v16 = vpop.f32.mrb[67].mxu0 }
 0xa7b   :  { %5717 = vmatmul.mubr.msk.f32.vlgmr.msra.gmra.mrb[68].mxu0 %vm141_vm0, %v5644_v10  ;;  %v3150_v10 = vld [vmem:[#allocation2 + $0x250] sm:$0xff] }
 0xa7c   :  { %6227 = vmatpush3.bf16.xpose.msk.msra.mxu0 %vm6633_vm1, %v6222_v23  ;;  %5719 = vmatprep.mubr.msk.f32.mxu0 %vm141_vm0, %v2502_v57  ;;  %v6240_v50 = vpack.c.bf16 %v3151_v46, %v3150_v10  ;;  %v3266_v57 = vld [vmem:[#allocation2 + $0x268] sm:$0xff] }
 0xa7d   :  { %6230 = vmatprep.subr.msk.bf16.mxu0 %vm6633_vm1, %v6228_v40 }
 0xa7f   :  { %5720 = vmatmul.mubr.msk.f32.gmra.mrb[70].mxu0 %vm141_vm0, %v5647_v53  ;;  %v3265_v53 = vld [vmem:[#allocation2 + $0x260] sm:$0xff] }
 0xa80   :  { %5730 = vmatprep.mubr.msk.f32.mxu0 %vm141_vm0, %v2512_v12  ;;  %v6246_v22 = vpack.c.bf16 %v3266_v57, %v3265_v53  ;;  %v7287_v12 = vld [vmem:[#allocation2 + $0x4c8] sm:$0xff]  ;;  %v3828_v53 = vld [vmem:[#allocation2 + $0x2d8] sm:$0xff] }
 0xa84   :  { %6233 = vmatpush3.bf16.xpose.msk.msra.mxu0 %vm6633_vm1, %v6228_v40  ;;  %v6272_v40 = vpack.c.bf16 %v3606_v37, %v3605_v31  ;;  %v4179_v31 = vld [vmem:[#allocation2 + $0x338] sm:$0xff] }
 0xa85   :  { %6236 = vmatprep.subr.msk.bf16.mxu0 %vm6633_vm1, %v6234_v45 }
 0xa8b   :  { %5731 = vmatmul.mubr.msk.f32.vlgmr.msra.gmra.mrb[68].mxu0 %vm141_vm0, %v5650_v62  ;;  %v3268_v62 = vld [vmem:[#allocation2 + $0x278] sm:$0xff] }
 0xa8c   :  { %6239 = vmatpush3.bf16.xpose.msk.msra.mxu0 %vm6633_vm1, %v6234_v45  ;;  %5733 = vmatprep.mubr.msk.f32.mxu0 %vm141_vm0, %v2522_v17  ;;  %v6252_v51 = vpack.c.bf16 %v3268_v62, %v3267_v59 }
 0xa8d   :  { %6242 = vmatprep.subr.msk.bf16.mxu0 %vm6633_vm1, %v6240_v50 }
 0xa8f   :  { %5734 = vmatmul.mubr.msk.f32.gmra.mrb[70].mxu0 %vm141_vm0, %v5653_v29  ;;  %v3385_v29 = vrot.slane %v7287_v12, %v139_v28 }
 0xa90   :  { %5744 = vmatprep.mubr.msk.f32.mxu0 %vm141_vm0, %v2532_v32 }
 0xa94   :  { %6245 = vmatpush3.bf16.xpose.msk.msra.mxu0 %vm6633_vm1, %v6240_v50  ;;  %v3827_v50 = vld [vmem:[#allocation2 + $0x2d0] sm:$0xff] }
 0xa95   :  { %6248 = vmatprep.subr.msk.bf16.mxu0 %vm6633_vm1, %v6246_v22 }
 0xa9b   :  { %5745 = vmatmul.mubr.msk.f32.vlgmr.msra.gmra.mrb[68].mxu0 %vm141_vm0, %v5656_v13 }
 0xa9c   :  { %6251 = vmatpush3.bf16.xpose.msk.msra.mxu0 %vm6633_vm1, %v6246_v22  ;;  %5747 = vmatprep.mubr.msk.f32.mxu0 %vm141_vm0, %v2542_v20  ;;  %v6296_v22 = vpack.c.bf16 %v3828_v53, %v3827_v50 }
 0xa9d   :  { %6254 = vmatprep.subr.msk.bf16.mxu0 %vm6633_vm1, %v6252_v51 }
 0xa9f   :  { %5748 = vmatmul.mubr.msk.f32.gmra.mrb[70].mxu0 %vm141_vm0, %v5659_v8 }
 0xaa0   :  { %5758 = vmatprep.mubr.msk.f32.mxu0 %vm141_vm0, %v2552_v24  ;;  %v3603_v24 = vld [vmem:[#allocation2 + $0x2a0] sm:$0xff] }
 0xaa4   :  { %6257 = vmatpush3.bf16.xpose.msk.msra.mxu0 %vm6633_vm1, %v6252_v51 }
 0xaab   :  { %5759 = vmatmul.mubr.msk.f32.vlgmr.msra.gmra.mrb[68].mxu0 %vm141_vm0, %v5662_v33 }
 0xaac   :  { %5761 = vmatprep.mubr.msk.f32.mxu0 %vm141_vm0, %v2562_v16 }
 0xaaf   :  { %5762 = vmatmul.mubr.msk.f32.gmra.mrb[70].mxu0 %vm141_vm0, %v5665_v25 }
 0xab0   :  { %5772 = vmatprep.mubr.msk.f32.mxu0 %vm141_vm0, %v6938_v48  ;;  %v3604_v48 = vld [vmem:[#allocation2 + $0x2a8] sm:$0xff] }
 0xab1   :  { %v6266_v16 = vpack.c.bf16 %v3604_v48, %v3603_v24  ;;  %v4176_v48 = vld [vmem:[#allocation2 + $0x320] sm:$0xff] }
 0xb7e   :  { %v5760_v17 = vpop.f32.mrb[68].mxu0 }
 0xb7f   :  { %v3387_v44 = vadd.f32 %v5760_v17, %v3385_v29  ;;  %v3359_v63 = vpop.f32.mrb[69].mxu0  ;;  %v3943_v17 = vld [vmem:[#allocation2 + $0x2e8] sm:$0xff] }
 0xb80   :  { %v3386_v13 = vadd.f32 %v3385_v29, %v3359_v63 }
 0xb81   :  { %v3391_v61 = vmax.f32 %v3387_v44, 0.0 }
 0xb82   :  { %v3390_v32 = vmax.f32 %v3386_v13, 0.0  ;;  %v5763_v8 = vpop.f32.mrb[70].mxu0 }
 0xb83   :  { %v3389_v20 = vadd.f32 %v5763_v8, %v3385_v29  ;;  %v3369_v54 = vpop.f32.mrb[71].mxu0 }
 0xb84   :  { %v6258_v14 = vpack.c.bf16 %v3391_v61, %v3390_v32  ;;  %v3388_v33 = vadd.f32 %v3385_v29, %v3369_v54  ;;  %v3942_v29 = vld [vmem:[#allocation2 + $0x2e0] sm:$0xff]  ;;  %v3944_v61 = vld [vmem:[#allocation2 + $0x2f0] sm:$0xff]  ;;  %v3945_v32 = vld [vmem:[#allocation2 + $0x2f8] sm:$0xff] }
 0xb85   :  { %v3393_v23 = vmax.f32 %v3389_v20, 0.0  ;;  %v6302_v63 = vpack.c.bf16 %v3943_v17, %v3942_v29  ;;  %v6308_v8 = vpack.c.bf16 %v3945_v32, %v3944_v61  ;;  %v4059_v20 = vld [vmem:[#allocation2 + $0x300] sm:$0xff]  ;;  %v4060_v54 = vld [vmem:[#allocation2 + $0x308] sm:$0xff]  ;;  %v133_v61 = vld [vmem:[#allocation4 + $0x88] sm:$0xff] }
 0xb86   :  { %v3392_v25 = vmax.f32 %v3388_v33, 0.0  ;;  %6259 = vmatprep.subr.bf16.mxu0 %v6258_v14  ;;  %6364 = vmatprep.subr.bf16.mxu1 %v6258_v14  ;;  %v4061_v33 = vld [vmem:[#allocation2 + $0x310] sm:$0xff] }
 0xb87   :  { %6261 = vmatpush3.bf16.msra.mxu0 %v6258_v14  ;;  %6366 = vmatpush3.bf16.msra.mxu1 %v6258_v14  ;;  %v6314_v14 = vpack.c.bf16 %v4060_v54, %v4059_v20 }
 0xb88   :  { %v6262_v28 = vpack.c.bf16 %v3393_v23, %v3392_v25  ;;  %v4062_v23 = vld [vmem:[#allocation2 + $0x318] sm:$0xff]  ;;  %v4177_v25 = vld [vmem:[#allocation2 + $0x328] sm:$0xff] }
 0xb89   :  { %v6320_v24 = vpack.c.bf16 %v4062_v23, %v4061_v33  ;;  %v135_v33 = vld [vmem:[#allocation4 + $0x98] sm:$0xff] }
 0xb8a   :  { %6263 = vmatprep.subr.bf16.mxu0 %v6262_v28  ;;  %6365 = vmatprep.subr.bf16.mxu1 %v6262_v28 }
 0xb8b   :  { %6265 = vmatpush3.bf16.msra.mxu0 %v6262_v28  ;;  %6367 = vmatpush3.bf16.msra.mxu1 %v6262_v28  ;;  %v6326_v28 = vpack.c.bf16 %v4177_v25, %v4176_v48 }
 0xb8c   :  { %6268 = vmatprep.subr.msk.bf16.mxu1 %vm6633_vm1, %v6266_v16 }
 0xb8e   :  { %5773 = vmatmul.mubr.msk.f32.vlgmr.msra.gmra.mrb[72].mxu0 %vm141_vm0, %v6954_v1  ;;  %5788 = vmatmul.mubr.msk.f32.vlgmr.msra.gmra.mrb[20].mxu1 %vm141_vm0, %v6994_v58  ;;  %v3599_v1 = vld [vmem:[#allocation2 + $0x280] sm:$0xff] }
 0xb8f   :  { %5775 = vmatprep.mubr.msk.f32.mxu0 %vm141_vm0, %v6956_v3  ;;  %5790 = vmatprep.mubr.msk.f32.mxu1 %vm141_vm0, %v6996_v18  ;;  %v3600_v3 = vld [vmem:[#allocation2 + $0x288] sm:$0xff] }
 0xb92   :  { %5776 = vmatmul.mubr.msk.f32.gmra.mrb[74].mxu0 %vm141_vm0, %v6962_v35  ;;  %5791 = vmatmul.mubr.msk.f32.gmra.mrb[22].mxu1 %vm141_vm0, %v7002_v6  ;;  %v6278_v35 = vpack.c.bf16 %v3600_v3, %v3599_v1  ;;  %v3601_v6 = vld [vmem:[#allocation2 + $0x290] sm:$0xff]  ;;  %v4294_v1 = vld [vmem:[#allocation2 + $0x348] sm:$0xff] }
 0xb93   :  { %5778 = vmatprep.mubr.msk.f32.mxu0 %vm141_vm0, %v6964_v36  ;;  %5793 = vmatprep.mubr.msk.f32.mxu1 %vm141_vm0, %v7004_v21  ;;  %v3602_v21 = vld [vmem:[#allocation2 + $0x298] sm:$0xff] }
 0xb94   :  { %6271 = vmatpush3.bf16.xpose.msk.msra.mxu1 %vm6633_vm1, %v6266_v16  ;;  %v4178_v16 = vld [vmem:[#allocation2 + $0x330] sm:$0xff] }
 0xb95   :  { %6274 = vmatprep.subr.msk.bf16.mxu1 %vm6633_vm1, %v6272_v40  ;;  %v6332_v37 = vpack.c.bf16 %v4179_v31, %v4178_v16  ;;  %v4936_v31 = vld [vmem:[#allocation4 + $0xa0] ss:$0 sm:$0xff] }
 0xb96   :  { %5779 = vmatmul.mubr.msk.f32.gmra.mrb[76].mxu0 %vm141_vm0, %v6970_v39  ;;  %5794 = vmatmul.mubr.msk.f32.gmra.mrb[24].mxu1 %vm141_vm0, %v7010_v2 }
 0xb97   :  { %5781 = vmatprep.mubr.msk.f32.mxu0 %vm141_vm0, %v6972_v41  ;;  %5796 = vmatprep.mubr.msk.f32.mxu1 %vm141_vm0, %v7012_v47 }
 0xb9a   :  { %5782 = vmatmul.mubr.msk.f32.gmra.mrb[78].mxu0 %vm141_vm0, %v6978_v4  ;;  %5797 = vmatmul.mubr.msk.f32.gmra.mrb[26].mxu1 %vm141_vm0, %v7018_v5 }
 0xb9b   :  { %5784 = vmatprep.mubr.msk.f32.mxu0 %vm141_vm0, %v6980_v11  ;;  %5799 = vmatprep.mubr.msk.f32.mxu1 %vm141_vm0, %v7020_v15  ;;  %v6284_v15 = vpack.c.bf16 %v3602_v21, %v3601_v6  ;;  %v6586_v21 = vmov 0.0  }
 0xb9c   :  { %6277 = vmatpush3.bf16.xpose.msk.msra.mxu1 %vm6633_vm1, %v6272_v40  ;;  %v4293_v40 = vld [vmem:[#allocation2 + $0x340] sm:$0xff] }
 0xb9d   :  { %6280 = vmatprep.subr.msk.bf16.mxu1 %vm6633_vm1, %v6278_v35  ;;  %v6338_v3 = vpack.c.bf16 %v4294_v1, %v4293_v40 }
 0xb9e   :  { %5785 = vmatmul.mubr.msk.f32.gmra.mrb[80].mxu0 %vm141_vm0, %v6986_v52  ;;  %5800 = vmatmul.mubr.msk.f32.gmra.mrb[28].mxu1 %vm141_vm0, %v7026_v49 }
 0xb9f   :  { %5802 = vmatprep.mubr.msk.f32.mxu1 %vm141_vm0, %v7028_v55  ;;  %5920 = vmatprep.mubr.msk.f32.mxu0 %vm6585_vm2, %v6586_v21 }
 0xba2   :  { %5803 = vmatmul.mubr.msk.f32.gmra.mrb[30].mxu1 %vm141_vm0, %v7034_v9 }
 0xba3   :  { %5805 = vmatprep.mubr.msk.f32.mxu1 %vm141_vm0, %v7036_v56 }
 0xba6   :  { %5806 = vmatmul.mubr.msk.f32.gmra.mrb[32].mxu1 %vm141_vm0, %v7042_v26 }
 0xba7   :  { %5808 = vmatprep.mubr.msk.f32.mxu1 %vm141_vm0, %v7044_v60  ;;  %v3825_v60 = vld [vmem:[#allocation2 + $0x2c0] sm:$0xff] }
 0xbaa   :  { %5809 = vmatmul.mubr.msk.f32.gmra.mrb[34].mxu1 %vm141_vm0, %v7050_v34  ;;  %v3826_v34 = vld [vmem:[#allocation2 + $0x2c8] sm:$0xff] }
 0xbab   :  { %5811 = vmatprep.mubr.msk.f32.mxu1 %vm141_vm0, %v7052_v7  ;;  %v6290_v38 = vpack.c.bf16 %v3826_v34, %v3825_v60 }
 0xbae   :  { %5812 = vmatmul.mubr.msk.f32.gmra.mrb[36].mxu1 %vm141_vm0, %v7058_v30 }
 0xc61   :  { %v5774_v36 = vpop.f32.mrb[72].mxu0  ;;  %v7354_v39 = vpop.f32.mrb[20].mxu1 }
 0xc62   :  { %v3460_v41 = vpop.f32.mrb[73].mxu0  ;;  %v3510_v4 = vpop.f32.mrb[21].mxu1 }
 0xc65   :  { %v5777_v11 = vpop.f32.mrb[74].mxu0  ;;  %v7356_v52 = vpop.f32.mrb[22].mxu1 }
 0xc66   :  { %v3470_v58 = vpop.f32.mrb[75].mxu0  ;;  %v3520_v18 = vpop.f32.mrb[23].mxu1 }
 0xc69   :  { %v5780_v2 = vpop.f32.mrb[76].mxu0  ;;  %v7358_v47 = vpop.f32.mrb[24].mxu1 }
 0xc6a   :  { %v3480_v5 = vpop.f32.mrb[77].mxu0  ;;  %v3530_v49 = vpop.f32.mrb[25].mxu1 }
 0xc6b   :  { %5822 = vmatprep.mubr.msk.f32.mxu1 %vm141_vm0, %v3480_v5 }
 0xc6c   :  { %5823 = vmatmul.mubr.msk.f32.vlgmr.msra.gmra.mrb[38].mxu1 %vm141_vm0, %v5780_v2  ;;  %v4413_v2 = vrot.slane %v7287_v12, %v253_v42 }
 0xc6d   :  { %6283 = vmatpush3.bf16.xpose.msk.msra.mxu1 %vm6633_vm1, %v6278_v35  ;;  %v5783_v55 = vpop.f32.mrb[78].mxu0  ;;  %v7364_v9 = vpop.f32.mrb[26].mxu1  ;;  %v4295_v35 = vld [vmem:[#allocation2 + $0x350] sm:$0xff] }
 0xc6e   :  { %6286 = vmatprep.subr.msk.bf16.mxu1 %vm6633_vm1, %v6284_v15  ;;  %v3490_v56 = vpop.f32.mrb[79].mxu0  ;;  %v3540_v26 = vpop.f32.mrb[27].mxu1 }
 0xc6f   :  { %5825 = vmatprep.mubr.msk.f32.mxu1 %vm141_vm0, %v3490_v56 }
 0xc70   :  { %5826 = vmatmul.mubr.msk.f32.gmra.mrb[40].mxu1 %vm141_vm0, %v5783_v55 }
 0xc71   :  { %5836 = vmatprep.mubr.msk.f32.mxu1 %vm141_vm0, %v3460_v41  ;;  %v5786_v7 = vpop.f32.mrb[80].mxu0  ;;  %v7371_v30 = vpop.f32.mrb[28].mxu1  ;;  %v66_v41 = vld [vmem:[#allocation2 + $0xa0] sm:$0xff] }
 0xc72   :  { %v3500_v19 = vpop.f32.mrb[81].mxu0  ;;  %v3550_v45 = vpop.f32.mrb[29].mxu1 }
 0xc75   :  { %6289 = vmatpush3.bf16.xpose.msk.msra.mxu1 %vm6633_vm1, %v6284_v15  ;;  %v7375_v10 = vpop.f32.mrb[30].mxu1 }
 0xc76   :  { %6292 = vmatprep.subr.msk.bf16.mxu1 %vm6633_vm1, %v6290_v38  ;;  %v3560_v46 = vpop.f32.mrb[31].mxu1 }
 0xc79   :  { %v7379_v57 = vpop.f32.mrb[32].mxu1 }
 0xc7a   :  { %v7381_v59 = vpop.f32.mrb[33].mxu1 }
 0xc7c   :  { %5837 = vmatmul.mubr.msk.f32.vlgmr.msra.gmra.mrb[38].mxu1 %vm141_vm0, %v5774_v36  ;;  %v4296_v36 = vld [vmem:[#allocation2 + $0x358] sm:$0xff] }
 0xc7d   :  { %6295 = vmatpush3.bf16.xpose.msk.msra.mxu1 %vm6633_vm1, %v6290_v38  ;;  %5839 = vmatprep.mubr.msk.f32.mxu1 %vm141_vm0, %v3470_v58  ;;  %v7387_v62 = vpop.f32.mrb[34].mxu1  ;;  %v68_v58 = vld [vmem:[#allocation2 + $0xb0] sm:$0xff] }
 0xc7e   :  { %6298 = vmatprep.subr.msk.bf16.mxu1 %vm6633_vm1, %v6296_v22  ;;  %v3580_v51 = vpop.f32.mrb[35].mxu1 }
 0xc80   :  { %5840 = vmatmul.mubr.msk.f32.gmra.mrb[40].mxu1 %vm141_vm0, %v5777_v11 }
 0xc81   :  { %5850 = vmatprep.mubr.msk.f32.mxu1 %vm141_vm0, %v3500_v19  ;;  %v5813_v44 = vpop.f32.mrb[36].mxu1 }
 0xc82   :  { %v3590_v13 = vpop.f32.mrb[37].mxu1 }
 0xc85   :  { %6301 = vmatpush3.bf16.xpose.msk.msra.mxu1 %vm6633_vm1, %v6296_v22 }
 0xc86   :  { %6304 = vmatprep.subr.msk.bf16.mxu1 %vm6633_vm1, %v6302_v63 }
 0xc8c   :  { %5851 = vmatmul.mubr.msk.f32.vlgmr.msra.gmra.mrb[38].mxu1 %vm141_vm0, %v5786_v7 }
 0xc8d   :  { %6307 = vmatpush3.bf16.xpose.msk.msra.mxu1 %vm6633_vm1, %v6302_v63  ;;  %5853 = vmatprep.mubr.msk.f32.mxu1 %vm141_vm0, %v3510_v4  ;;  %v67_v4 = vld [vmem:[#allocation2 + $0xa8] sm:$0xff] }
 0xc8e   :  { %6310 = vmatprep.subr.msk.bf16.mxu1 %vm6633_vm1, %v6308_v8  ;;  %v6351_v11 = vpack.c.bf16 %v67_v4, %v66_v41 }
 0xc90   :  { %5854 = vmatmul.mubr.msk.f32.gmra.mrb[40].mxu1 %vm141_vm0, %v7354_v39  ;;  %v6344_v39 = vpack.c.bf16 %v4296_v36, %v4295_v35 }
 0xc91   :  { %5864 = vmatprep.mubr.msk.f32.mxu1 %vm141_vm0, %v3520_v18  ;;  %v69_v18 = vld [vmem:[#allocation2 + $0xb8] sm:$0xff] }
 0xc92   :  { %v6355_v6 = vpack.c.bf16 %v69_v18, %v68_v58 }
 0xc95   :  { %6313 = vmatpush3.bf16.xpose.msk.msra.mxu1 %vm6633_vm1, %v6308_v8 }
 0xc96   :  { %6316 = vmatprep.subr.msk.bf16.mxu1 %vm6633_vm1, %v6314_v14 }
 0xc9c   :  { %5865 = vmatmul.mubr.msk.f32.vlgmr.msra.gmra.mrb[38].mxu1 %vm141_vm0, %v7356_v52  ;;  %v6584_v52 = vmov 0.0|0.0  }
 0xc9d   :  { %6319 = vmatpush3.bf16.xpose.msk.msra.mxu1 %vm6633_vm1, %v6314_v14  ;;  %5867 = vmatprep.mubr.msk.f32.mxu1 %vm141_vm0, %v3530_v49  ;;  %v134_v14 = vld [vmem:[#allocation4 + $0x90] sm:$0xff] }
 0xc9e   :  { %6322 = vmatprep.subr.msk.bf16.mxu1 %vm6633_vm1, %v6320_v24  ;;  %6350 = vmatprep.subr.bf16.mxu0 %v6584_v52  ;;  %v6362_v23 = vpack.c.bf16 %v135_v33, %v134_v14 }
 0xc9f   :  { %6353 = vmatpush3.bf16.xpose.msk.msra.mxu0 %vm6633_vm1, %v6351_v11 }
 0xca0   :  { %5868 = vmatmul.mubr.msk.f32.gmra.mrb[40].mxu1 %vm141_vm0, %v7358_v47  ;;  %6354 = vmatprep.subr.bf16.mxu0 %v6584_v52 }
 0xca1   :  { %5878 = vmatprep.mubr.msk.f32.mxu1 %vm141_vm0, %v3540_v26 }
 0xca5   :  { %6325 = vmatpush3.bf16.xpose.msk.msra.mxu1 %vm6633_vm1, %v6320_v24  ;;  %v4448_v24 = vrot.slane %v7287_v12, %v370_v43 }
 0xca6   :  { %6328 = vmatprep.subr.msk.bf16.mxu1 %vm6633_vm1, %v6326_v28 }
 0xca7   :  { %6357 = vmatpush3.bf16.xpose.msk.msra.mxu0 %vm6633_vm1, %v6355_v6 }
 0xca8   :  { %6358 = vmatprep.subr.bf16.mxu0 %v6584_v52 }
 0xcac   :  { %5879 = vmatmul.mubr.msk.f32.vlgmr.msra.gmra.mrb[38].mxu1 %vm141_vm0, %v7364_v9 }
 0xcad   :  { %6331 = vmatpush3.bf16.xpose.msk.msra.mxu1 %vm6633_vm1, %v6326_v28  ;;  %5881 = vmatprep.mubr.msk.f32.mxu1 %vm141_vm0, %v3550_v45 }
 0xcae   :  { %6334 = vmatprep.subr.msk.bf16.mxu1 %vm6633_vm1, %v6332_v37 }
 0xcb0   :  { %5882 = vmatmul.mubr.msk.f32.gmra.mrb[40].mxu1 %vm141_vm0, %v7371_v30 }
 0xcb1   :  { %5892 = vmatprep.mubr.msk.f32.mxu1 %vm141_vm0, %v3560_v46 }
 0xcb5   :  { %6337 = vmatpush3.bf16.xpose.msk.msra.mxu1 %vm6633_vm1, %v6332_v37 }
 0xcb6   :  { %6340 = vmatprep.subr.msk.bf16.mxu1 %vm6633_vm1, %v6338_v3 }
 0xcbc   :  { %5893 = vmatmul.mubr.msk.f32.vlgmr.msra.gmra.mrb[38].mxu1 %vm141_vm0, %v7375_v10 }
 0xcbd   :  { %6343 = vmatpush3.bf16.xpose.msk.msra.mxu1 %vm6633_vm1, %v6338_v3  ;;  %5895 = vmatprep.mubr.msk.f32.mxu1 %vm141_vm0, %v7381_v59 }
 0xcbe   :  { %6346 = vmatprep.subr.msk.bf16.mxu1 %vm6633_vm1, %v6344_v39 }
 0xcc0   :  { %5896 = vmatmul.mubr.msk.f32.gmra.mrb[40].mxu1 %vm141_vm0, %v7379_v57 }
 0xcc1   :  { %5906 = vmatprep.mubr.msk.f32.mxu1 %vm141_vm0, %v3580_v51 }
 0xcc5   :  { %6349 = vmatpush3.bf16.xpose.msk.msra.mxu1 %vm6633_vm1, %v6344_v39 }
 0xccc   :  { %5907 = vmatmul.mubr.msk.f32.vlgmr.msra.gmra.mrb[38].mxu1 %vm141_vm0, %v7387_v62 }
 0xccd   :  { %5909 = vmatprep.mubr.msk.f32.mxu1 %vm141_vm0, %v3590_v13  ;;  %v132_v13 = vld [vmem:[#allocation4 + $0x80] sm:$0xff] }
 0xcce   :  { %v6359_v20 = vpack.c.bf16 %v133_v61, %v132_v13 }
 0xcd0   :  { %5910 = vmatmul.mubr.msk.f32.gmra.mrb[40].mxu1 %vm141_vm0, %v5813_v44 }
 0xd9f   :  { %v5908_v47 = vpop.f32.mrb[38].mxu1 }
 0xda0   :  { %v4415_v5 = vadd.f32 %v5908_v47, %v4413_v2  ;;  %v4387_v15 = vpop.f32.mrb[39].mxu1 }
 0xda1   :  { %v4414_v49 = vadd.f32 %v4413_v2, %v4387_v15 }
 0xda2   :  { %v4419_v55 = vmax.f32 %v4415_v5, 0.0 }
 0xda3   :  { %v4418_v9 = vmax.f32 %v4414_v49, 0.0  ;;  %v5911_v56 = vpop.f32.mrb[40].mxu1 }
 0xda4   :  { %v4423_v26 = vsel %vm141_vm0, %v4419_v55, 0.0  ;;  %v4417_v0 = vadd.f32 %v5911_v56, %v4413_v2  ;;  %v4397_v60 = vpop.f32.mrb[41].mxu1 }
 0xda5   :  { %v4422_v34 = vsel %vm141_vm0, %v4418_v9, 0.0  ;;  %v4416_v7 = vadd.f32 %v4413_v2, %v4397_v60 }
 0xda6   :  { %v4424_v30 = vadd.f32 %v4423_v26, %v4422_v34  ;;  %v4421_v38 = vmax.f32 %v4417_v0, 0.0 }
 0xda7   :  { %v4420_v19 = vmax.f32 %v4416_v7, 0.0 }
 0xda8   :  { %v4425_v45 = vrot.slane %v4424_v30, 4  ;;  %v4432_v42 = vsel %vm141_vm0, %v4421_v38, 0.0 }
 0xda9   :  { %v4431_v10 = vsel %vm141_vm0, %v4420_v19, 0.0 }
 0xdaa   :  { %v4426_v46 = vadd.f32 %v4425_v45, %v4424_v30  ;;  %v4433_v50 = vadd.f32 %v4432_v42, %v4431_v10 }
 0xdac   :  { %v4427_v53 = vrot.slane %v4426_v46, 2  ;;  %v4434_v57 = vrot.slane %v4433_v50, 4 }
 0xdae   :  { %v4428_v22 = vadd.f32 %v4427_v53, %v4426_v46  ;;  %v4435_v59 = vadd.f32 %v4434_v57, %v4433_v50 }
 0xdb0   :  { %v4436_v62 = vrot.slane %v4435_v59, 2  ;;  %v4429_v51 = vrot.slane %v4428_v22, 1 }
 0xdb2   :  { %v4437_v29 = vadd.f32 %v4436_v62, %v4435_v59  ;;  %v4430_v44 = vadd.f32 %v4429_v51, %v4428_v22 }
 0xdb4   :  { %v4438_v17 = vrot.slane %v4437_v29, 1 }
 0xdb6   :  { %v4439_v63 = vadd.f32 %v4438_v17, %v4437_v29 }
 0xdb8   :  { %v4441_v32 = vsel %vm4440_vm3, %v4430_v44, %v4439_v63 }
 0xdb9   :  { %v4443_v8 = vsel %vm4442_vm4, %v4441_v32, 0.0 }
 0xdba   :  { %v4444_v54 = vmul.f32 0.0625, %v4443_v8 }
 0xdbc   :  { %5921 = vmatmul.mubr.msk.f32.vlgmr.msra.gmra.mrb[82].mxu0 %vm141_vm0, %v4444_v54 }
 0xdbd   :  { %6360 = vmatpush3.bf16.msra.mxu0 %v6359_v20  ;;  %5931 = vmatprep.mubr.msk.f32.mxu0 %vm6585_vm2, %v6586_v21 }
 0xdbe   :  { %6361 = vmatprep.subr.bf16.mxu0 %v6584_v52 }
 0xdc1   :  { %6363 = vmatpush3.bf16.msra.mxu0 %v6362_v23 }
 0xe8f   :  { %v4530_v48 = vpop.f32.mrb[82].mxu0 }
 0xe90   :  { %v4531_v25 = vadd.f32 %v4530_v48, %v4448_v24  ;;  %v5922_v28 = vpop.f32.mrb[83].mxu0 }
 0xe92   :  { %v4534_v16 = vmax.f32 %v4531_v25, 0.0 }
 0xe94   :  { %5932 = vmatmul.mubr.msk.f32.vlgmr.msra.gmra.mrb[84].mxu0 %vm141_vm0, %v4534_v16 }
 0xf67   :  { %v4608_v37 = vpop.f32.mrb[84].mxu0 }
 0xf68   :  { %v4609_v40 = vadd.f32 %v4936_v31, %v4608_v37  ;;  %v5933_v1 = vpop.f32.mrb[85].mxu0 }
 0xf6a   :  { %4612 = vst [vmem:[%s7479_s3] sm:$0xff] %v4609_v40 }
 0xf6b   :  { %4617 = vsyncpa [#allocation3], 1 }
 0xf6c   :  { %4618 = vsyncpa [#allocation5], 1 }

</bundles_post_ra>
